<compile_context>
chip_gen: v5e
topology: v5e:2x2
jax: 0.10.0
libtpu: 0.0.40
codegen_flags: <defaults>
</compile_context>

<pallas_src>
import functools

import jax
import jax.numpy as jnp
from jax.experimental import pallas as pl
from jax.experimental.pallas import tpu as pltpu


# --------------------------------------------------------------------------
# helpers
# --------------------------------------------------------------------------
def _pick_row_tile(m, target=512):
    """Largest row tile <= target that divides m (falls back to whole array).

    target=512 gives good DMA/compute overlap on v5e/v6e (128 MiB VMEM).
    On v7x (64 MiB VMEM) pass target=256 so double-buffered fp32 FFN hidden
    tiles stay inside the scoped-VMEM budget.
    """
    if m <= target:
        return m
    for t in (512, 256, 128, 64, 32, 16, 8):
        if t <= target and m % t == 0:
            return t
    return m


def _full_spec(arr):
    # Whole-array block with a constant index map -> fetched once, resident across grid steps.
    nd = arr.ndim
    return pl.BlockSpec(arr.shape, lambda *_: (0,) * nd)


# --------------------------------------------------------------------------
# Attention kernels (one (batch) per grid step; all heads processed lane-dense)
# --------------------------------------------------------------------------
def _self_attn_kernel(x_ref, wqkv_ref, bqkv_ref, wo_ref, bo_ref, o_ref, *, num_heads):
    _, Lq, E = x_ref.shape
    H = num_heads
    Dh = E // H

    x = x_ref[0].astype(jnp.bfloat16)                                   # (Lq, E)
    # fused q|k|v projection; 1/sqrt(Dh) already folded into the q columns/bias
    qkv = jnp.dot(x, wqkv_ref[...],
                  preferred_element_type=jnp.float32) + bqkv_ref[...]   # (Lq, 3E) fp32
    wo = wo_ref[...]                                                    # (E, E) fp32

    acc = jnp.zeros((Lq, E), jnp.float32)
    for h in range(H):                                                  # static unroll
        q_h = qkv[:, h * Dh:(h + 1) * Dh].astype(jnp.bfloat16)          # (Lq, Dh)
        k_h = qkv[:, E + h * Dh:E + (h + 1) * Dh].astype(jnp.bfloat16)  # (Lq, Dh)
        v_h = qkv[:, 2 * E + h * Dh:2 * E + (h + 1) * Dh].astype(jnp.bfloat16)
        s = jax.lax.dot_general(q_h, k_h, (((1,), (1,)), ((), ())),
                                preferred_element_type=jnp.float32)     # (Lq, Lq)
        m = jnp.max(s, axis=-1, keepdims=True)
        e = jnp.exp(s - m)
        p = e * pl.reciprocal(jnp.sum(e, axis=-1, keepdims=True), approx=True)
        pv = jnp.dot(p.astype(jnp.bfloat16), v_h,
                     preferred_element_type=jnp.float32)                # (Lq, Dh)
        wo_h = wo[h * Dh:(h + 1) * Dh, :].astype(jnp.bfloat16)          # (Dh, E)
        acc = acc + jnp.dot(pv.astype(jnp.bfloat16), wo_h,
                            preferred_element_type=jnp.float32)         # (Lq, E)
    o_ref[0] = (acc + bo_ref[...]).astype(o_ref.dtype)


def _cross_attn_kernel(xq_ref, xkv_ref, wq_ref, bq_ref, wkv_ref, bkv_ref,
                       wo_ref, bo_ref, o_ref, aw_ref, *, num_heads):
    _, Lq, E = xq_ref.shape
    Lk = xkv_ref.shape[1]
    H = num_heads
    Dh = E // H

    xq = xq_ref[0].astype(jnp.bfloat16)                                 # (Lq, E)
    xkv = xkv_ref[0].astype(jnp.bfloat16)                               # (Lk, E)
    q = jnp.dot(xq, wq_ref[...],
                preferred_element_type=jnp.float32) + bq_ref[...]       # (Lq, E), scale folded
    kv = jnp.dot(xkv, wkv_ref[...],
                 preferred_element_type=jnp.float32) + bkv_ref[...]     # (Lk, 2E)
    wo = wo_ref[...]                                                    # (E, E) fp32

    acc = jnp.zeros((Lq, E), jnp.float32)
    w_acc = jnp.zeros((Lq, Lk), jnp.float32)
    for h in range(H):                                                  # static unroll
        q_h = q[:, h * Dh:(h + 1) * Dh].astype(jnp.bfloat16)
        k_h = kv[:, h * Dh:(h + 1) * Dh].astype(jnp.bfloat16)
        v_h = kv[:, E + h * Dh:E + (h + 1) * Dh].astype(jnp.bfloat16)
        s = jax.lax.dot_general(q_h, k_h, (((1,), (1,)), ((), ())),
                                preferred_element_type=jnp.float32)     # (Lq, Lk)
        m = jnp.max(s, axis=-1, keepdims=True)
        e = jnp.exp(s - m)
        p = e * pl.reciprocal(jnp.sum(e, axis=-1, keepdims=True), approx=True)
        w_acc = w_acc + p
        pv = jnp.dot(p.astype(jnp.bfloat16), v_h,
                     preferred_element_type=jnp.float32)
        wo_h = wo[h * Dh:(h + 1) * Dh, :].astype(jnp.bfloat16)
        acc = acc + jnp.dot(pv.astype(jnp.bfloat16), wo_h,
                            preferred_element_type=jnp.float32)
    o_ref[0] = (acc + bo_ref[...]).astype(o_ref.dtype)
    aw_ref[0] = (w_acc * (1.0 / H)).astype(aw_ref.dtype)                # head-average in kernel


def self_attention_pallas(x_bm, p, num_heads):
    """x_bm: (B, Lq, E) batch-major. Returns (B, Lq, E). No attention weights written."""
    B, Lq, E = x_bm.shape
    scale = (E // num_heads) ** -0.5
    # fold 1/sqrt(Dh) into the q projection, fuse q|k|v into one (E, 3E) bf16 matmul
    wqkv = jnp.concatenate([p["wq"] * scale, p["wk"], p["wv"]], axis=1).astype(jnp.bfloat16)
    bqkv = jnp.concatenate([p["bq"] * scale, p["bk"], p["bv"]]).reshape(1, 3 * E).astype(jnp.float32)
    wo = p["wo"].astype(jnp.float32)
    bo = p["bo"].reshape(1, E).astype(jnp.float32)
    return pl.pallas_call(
        functools.partial(_self_attn_kernel, num_heads=num_heads),
        grid=(B,),
        in_specs=[
            pl.BlockSpec((1, Lq, E), lambda b: (b, 0, 0)),
            _full_spec(wqkv), _full_spec(bqkv),
            _full_spec(wo), _full_spec(bo),
        ],
        out_specs=pl.BlockSpec((1, Lq, E), lambda b: (b, 0, 0)),
        out_shape=jax.ShapeDtypeStruct((B, Lq, E), jnp.float32),
        compiler_params=pltpu.CompilerParams(dimension_semantics=("parallel",)),
    )(x_bm, wqkv, bqkv, wo, bo)


def cross_attention_pallas(xq_bm, xkv_bm, p, num_heads):
    """xq_bm: (B, Lq, E); xkv_bm: (B, Lk, E). Returns ((B, Lq, E), (B, Lq, Lk) avg weights)."""
    B, Lq, E = xq_bm.shape
    Lk = xkv_bm.shape[1]
    scale = (E // num_heads) ** -0.5
    wq = (p["wq"] * scale).astype(jnp.bfloat16)
    bq = (p["bq"] * scale).reshape(1, E).astype(jnp.float32)
    wkv = jnp.concatenate([p["wk"], p["wv"]], axis=1).astype(jnp.bfloat16)
    bkv = jnp.concatenate([p["bk"], p["bv"]]).reshape(1, 2 * E).astype(jnp.float32)
    wo = p["wo"].astype(jnp.float32)
    bo = p["bo"].reshape(1, E).astype(jnp.float32)
    o, attn = pl.pallas_call(
        functools.partial(_cross_attn_kernel, num_heads=num_heads),
        grid=(B,),
        in_specs=[
            pl.BlockSpec((1, Lq, E), lambda b: (b, 0, 0)),
            pl.BlockSpec((1, Lk, E), lambda b: (b, 0, 0)),
            _full_spec(wq), _full_spec(bq),
            _full_spec(wkv), _full_spec(bkv),
            _full_spec(wo), _full_spec(bo),
        ],
        out_specs=[
            pl.BlockSpec((1, Lq, E), lambda b: (b, 0, 0)),
            pl.BlockSpec((1, Lq, Lk), lambda b: (b, 0, 0)),
        ],
        out_shape=[
            jax.ShapeDtypeStruct((B, Lq, E), jnp.float32),
            jax.ShapeDtypeStruct((B, Lq, Lk), jnp.float32),
        ],
        compiler_params=pltpu.CompilerParams(dimension_semantics=("parallel",)),
    )(xq_bm, xkv_bm, wq, bq, wkv, bkv, wo, bo)
    return o, attn


# --------------------------------------------------------------------------
# FFN kernel (fc1 + relu + fc2 fused, row-tiled)
# --------------------------------------------------------------------------
def _ffn_kernel(x_ref, w1_ref, b1_ref, w2_ref, b2_ref, o_ref):
    xb = x_ref[...].astype(jnp.bfloat16)
    h = jnp.dot(xb, w1_ref[...], preferred_element_type=jnp.float32) + b1_ref[...]
    h = jnp.maximum(h, 0.0).astype(jnp.bfloat16)                        # relu activation_fn
    o_ref[...] = (jnp.dot(h, w2_ref[...], preferred_element_type=jnp.float32)
                  + b2_ref[...]).astype(o_ref.dtype)


def ffn_pallas(x2d, w1, b1, w2, b2, target_rows=512):
    M, E = x2d.shape
    F = w1.shape[1]
    tm = _pick_row_tile(M, target_rows)
    w1b = w1.astype(jnp.bfloat16)
    w2b = w2.astype(jnp.bfloat16)
    b1r = b1.reshape(1, F).astype(jnp.float32)
    b2r = b2.reshape(1, E).astype(jnp.float32)
    return pl.pallas_call(
        _ffn_kernel,
        grid=(M // tm,),
        in_specs=[
            pl.BlockSpec((tm, E), lambda i: (i, 0)),
            _full_spec(w1b), _full_spec(b1r),
            _full_spec(w2b), _full_spec(b2r),
        ],
        out_specs=pl.BlockSpec((tm, E), lambda i: (i, 0)),
        out_shape=jax.ShapeDtypeStruct((M, E), jnp.float32),
        compiler_params=pltpu.CompilerParams(dimension_semantics=("parallel",)),
    )(x2d, w1b, b1r, w2b, b2r)


# --------------------------------------------------------------------------
# LayerNorm kernels (row-tiled, fp32 statistics)
# --------------------------------------------------------------------------
def _combine_ln_kernel(res_ref, x1_ref, x2_ref, x3_ref, g_ref, b_ref, o_ref, *, eps):
    s = res_ref[...] + x1_ref[...] + x2_ref[...] + x3_ref[...]
    mean = jnp.mean(s, axis=-1, keepdims=True)
    c = s - mean
    var = jnp.mean(c * c, axis=-1, keepdims=True)
    o_ref[...] = (c * jax.lax.rsqrt(var + eps) * g_ref[...] + b_ref[...]).astype(o_ref.dtype)


def combine_layernorm_pallas(res, x1, x2, x3, gamma, beta, eps=1e-5, target_rows=512):
    M, E = res.shape
    tm = _pick_row_tile(M, target_rows)
    g = gamma.reshape(1, E).astype(jnp.float32)
    b = beta.reshape(1, E).astype(jnp.float32)
    row_spec = pl.BlockSpec((tm, E), lambda i: (i, 0))
    return pl.pallas_call(
        functools.partial(_combine_ln_kernel, eps=eps),
        grid=(M // tm,),
        in_specs=[row_spec, row_spec, row_spec, row_spec, _full_spec(g), _full_spec(b)],
        out_specs=row_spec,
        out_shape=jax.ShapeDtypeStruct((M, E), jnp.float32),
        compiler_params=pltpu.CompilerParams(dimension_semantics=("parallel",)),
    )(res, x1, x2, x3, g, b)


def _ln_kernel(x_ref, g_ref, b_ref, o_ref, *, eps):
    s = x_ref[...]
    mean = jnp.mean(s, axis=-1, keepdims=True)
    c = s - mean
    var = jnp.mean(c * c, axis=-1, keepdims=True)
    o_ref[...] = (c * jax.lax.rsqrt(var + eps) * g_ref[...] + b_ref[...]).astype(o_ref.dtype)


def layernorm_pallas(x2d, gamma, beta, eps=1e-5, target_rows=512):
    M, E = x2d.shape
    tm = _pick_row_tile(M, target_rows)
    g = gamma.reshape(1, E).astype(jnp.float32)
    b = beta.reshape(1, E).astype(jnp.float32)
    row_spec = pl.BlockSpec((tm, E), lambda i: (i, 0))
    return pl.pallas_call(
        functools.partial(_ln_kernel, eps=eps),
        grid=(M // tm,),
        in_specs=[row_spec, _full_spec(g), _full_spec(b)],
        out_specs=row_spec,
        out_shape=jax.ShapeDtypeStruct((M, E), jnp.float32),
        compiler_params=pltpu.CompilerParams(dimension_semantics=("parallel",)),
    )(x2d, g, b)


# --------------------------------------------------------------------------
# Layer wrapper (batch-major layout for the whole layer)
# --------------------------------------------------------------------------
def transformer_combine_decoder_layer(x, encoder_out, params, num_heads,
                                      normalize_before=False, target_rows=512):
    """x: (tgt_len, B, E); encoder_out: (src_len, B, E). Returns ((tgt_len, B, E), (B, tgt_len, src_len))."""
    Lq, B, E = x.shape
    x_bm = jnp.transpose(x, (1, 0, 2))                 # (B, Lq, E) — single layout change in
    enc_bm = jnp.transpose(encoder_out, (1, 0, 2))     # (B, Ls, E)
    res2d = x_bm.reshape(B * Lq, E)

    if normalize_before:
        # fairseq applies self_attn_layer_norm both pre (before=True) and post (after=True)
        xn2d = layernorm_pallas(res2d, params["ln_g"], params["ln_b"], target_rows=target_rows)
        xn_bm = xn2d.reshape(B, Lq, E)
    else:
        xn2d = res2d
        xn_bm = x_bm

    # x1: self attention (need_weights=False -> no weight output at all)
    x1_bm = self_attention_pallas(xn_bm, params["self_attn"], num_heads)
    # x2: encoder attention (need_weights=True in eval -> head-averaged weights)
    x2_bm, attn = cross_attention_pallas(xn_bm, enc_bm, params["encoder_attn"], num_heads)
    # x3: FFN on the same (maybe pre-normed) x
    x3_2d = ffn_pallas(xn2d, params["fc1_w"], params["fc1_b"],
                       params["fc2_w"], params["fc2_b"], target_rows=target_rows)

    if normalize_before:
        # post-LN is identity in pre-norm mode; plain residual sum (single elementwise add)
        out2d = res2d + x1_bm.reshape(B * Lq, E) + x2_bm.reshape(B * Lq, E) + x3_2d
    else:
        out2d = combine_layernorm_pallas(
            res2d, x1_bm.reshape(B * Lq, E), x2_bm.reshape(B * Lq, E), x3_2d,
            params["ln_g"], params["ln_b"], target_rows=target_rows)

    out = jnp.transpose(out2d.reshape(B, Lq, E), (1, 0, 2))   # back to (Lq, B, E)
    return out, attn


# --------------------------------------------------------------------------
# Pure-JAX fp32 reference (for correctness check)
# --------------------------------------------------------------------------
def _ref_mha(query, key, value, p, num_heads):
    Lq, B, E = query.shape
    Lk = key.shape[0]
    H, Dh = num_heads, E // num_heads
    scale = Dh ** -0.5
    q = query.reshape(Lq * B, E) @ p["wq"] + p["bq"]
    k = key.reshape(Lk * B, E) @ p["wk"] + p["bk"]
    v = value.reshape(Lk * B, E) @ p["wv"] + p["bv"]
    q = q.reshape(Lq, B * H, Dh).transpose(1, 0, 2) * scale
    k = k.reshape(Lk, B * H, Dh).transpose(1, 0, 2)
    v = v.reshape(Lk, B * H, Dh).transpose(1, 0, 2)
    s = jnp.einsum("bqd,bkd->bqk", q, k)
    w = jax.nn.softmax(s, axis=-1)
    o = jnp.einsum("bqk,bkd->bqd", w, v)
    o = o.transpose(1, 0, 2).reshape(Lq * B, E) @ p["wo"] + p["bo"]
    return o.reshape(Lq, B, E), w.reshape(B, H, Lq, Lk).mean(axis=1)


def _ref_layer(x, enc, params, num_heads, normalize_before=False):
    def ln(y):
        mean = jnp.mean(y, axis=-1, keepdims=True)
        var = jnp.mean((y - mean) ** 2, axis=-1, keepdims=True)
        return (y - mean) / jnp.sqrt(var + 1e-5) * params["ln_g"] + params["ln_b"]

    residual = x
    xn = ln(x) if normalize_before else x
    x1, _ = _ref_mha(xn, xn, xn, params["self_attn"], num_heads)
    x2, attn = _ref_mha(xn, enc, enc, params["encoder_attn"], num_heads)
    Lq, B, E = x.shape
    h = jnp.maximum(xn.reshape(Lq * B, E) @ params["fc1_w"] + params["fc1_b"], 0.0)
    x3 = (h @ params["fc2_w"] + params["fc2_b"]).reshape(Lq, B, E)
    s = residual + x1 + x2 + x3
    out = s if normalize_before else ln(s)
    return out, attn


# --------------------------------------------------------------------------
# Main
# --------------------------------------------------------------------------
def _init_attn_params(key, E):
    ks = jax.random.split(key, 4)
    mk = lambda k: (jax.random.normal(k, (E, E), jnp.float32) * 0.05)
    return {
        "wq": mk(ks[0]), "bq": jnp.zeros((E,), jnp.float32),
        "wk": mk(ks[1]), "bk": jnp.zeros((E,), jnp.float32),
        "wv": mk(ks[2]), "bv": jnp.zeros((E,), jnp.float32),
        "wo": mk(ks[3]), "bo": jnp.zeros((E,), jnp.float32),
    }


if __name__ == "__main__":
    # small shapes consistent with the module
    TGT_LEN, SRC_LEN, BATCH = 8, 16, 2
    EMBED_DIM, NUM_HEADS, FFN_DIM = 32, 4, 64

    root = jax.random.PRNGKey(0)
    k_x, k_enc, k_sa, k_ca, k_f1, k_f2 = jax.random.split(root, 6)

    x = jax.random.normal(k_x, (TGT_LEN, BATCH, EMBED_DIM), jnp.float32)
    encoder_out = jax.random.normal(k_enc, (SRC_LEN, BATCH, EMBED_DIM), jnp.float32)

    params = {
        "self_attn": _init_attn_params(k_sa, EMBED_DIM),
        "encoder_attn": _init_attn_params(k_ca, EMBED_DIM),
        "fc1_w": jax.random.normal(k_f1, (EMBED_DIM, FFN_DIM), jnp.float32) * 0.05,
        "fc1_b": jnp.zeros((FFN_DIM,), jnp.float32),
        "fc2_w": jax.random.normal(k_f2, (FFN_DIM, EMBED_DIM), jnp.float32) * 0.05,
        "fc2_b": jnp.zeros((EMBED_DIM,), jnp.float32),
        "ln_g": jnp.ones((EMBED_DIM,), jnp.float32),
        "ln_b": jnp.zeros((EMBED_DIM,), jnp.float32),
    }

    layer = jax.jit(transformer_combine_decoder_layer,
                    static_argnames=("num_heads", "normalize_before", "target_rows"))

    for nb in (False, True):
        out, attn = layer(x, encoder_out, params, num_heads=NUM_HEADS, normalize_before=nb)
        jax.block_until_ready((out, attn))
        out_ref, attn_ref = _ref_layer(x, encoder_out, params, NUM_HEADS, normalize_before=nb)

        assert out.shape == (TGT_LEN, BATCH, EMBED_DIM)
        assert attn.shape == (BATCH, TGT_LEN, SRC_LEN)
        # bf16 MXU operands (fp32 accumulation) + approx softmax reciprocal vs fp32 reference
        assert jnp.allclose(out, out_ref, rtol=2e-2, atol=2e-2), f"out mismatch (normalize_before={nb})"
        assert jnp.allclose(attn, attn_ref, rtol=2e-2, atol=2e-2), f"attn mismatch (normalize_before={nb})"

    print("KERNEL_OK")
</pallas_src>

<mosaic_0001>
module attributes {stable_mosaic.version = 11 : i64} {
  func.func @_self_attn_kernel(%arg0: i32, %arg1: memref<1x8x32xf32, #tpu.memory_space<vmem>>, %arg2: memref<32x96xbf16, #tpu.memory_space<vmem>>, %arg3: memref<1x96xf32, #tpu.memory_space<vmem>>, %arg4: memref<32x32xf32, #tpu.memory_space<vmem>>, %arg5: memref<1x32xf32, #tpu.memory_space<vmem>>, %arg6: memref<1x8x32xf32, #tpu.memory_space<vmem>>) attributes {dimension_semantics = [#tpu.dimension_semantics<parallel>], iteration_bounds = array<i64: 2>, scalar_prefetch = 0 : i64, scratch_operands = 0 : i64, tpu.core_type = #tpu.core_type<tc>, window_params = [{transform_indices = @transform_0, window_bounds = array<i64: 1, 8, 32>}, {pipeline_mode = #tpu.pipeline_mode<synchronous>, transform_indices = @transform_1, window_bounds = array<i64: 32, 96>}, {pipeline_mode = #tpu.pipeline_mode<synchronous>, transform_indices = @transform_2, window_bounds = array<i64: 1, 96>}, {pipeline_mode = #tpu.pipeline_mode<synchronous>, transform_indices = @transform_3, window_bounds = array<i64: 32, 32>}, {pipeline_mode = #tpu.pipeline_mode<synchronous>, transform_indices = @transform_4, window_bounds = array<i64: 1, 32>}, {transform_indices = @transform_5, window_bounds = array<i64: 1, 8, 32>}]} {
    %c0 = arith.constant 0 : index
    %c0_0 = arith.constant 0 : index
    %c0_1 = arith.constant 0 : index
    %0 = vector.load %arg1[%c0, %c0_0, %c0_1] : memref<1x8x32xf32, #tpu.memory_space<vmem>>, vector<1x8x32xf32>
    %1 = vector.shape_cast %0 : vector<1x8x32xf32> to vector<8x32xf32>
    %2 = arith.truncf %1 : vector<8x32xf32> to vector<8x32xbf16>
    %c0_2 = arith.constant 0 : index
    %c0_3 = arith.constant 0 : index
    %3 = vector.load %arg2[%c0_2, %c0_3] : memref<32x96xbf16, #tpu.memory_space<vmem>>, vector<32x96xbf16>
    %cst = arith.constant dense<0.000000e+00> : vector<8x96xf32>
    %4 = tpu.matmul %2, %3, %cst {dimension_numbers = #tpu.dot_dimension_numbers<[1], [0], [0], [1], [0, 0, 1, 1], [], []>} : vector<8x32xbf16>, vector<32x96xbf16>, vector<8x96xf32> -> vector<8x96xf32>
    %c0_4 = arith.constant 0 : index
    %c0_5 = arith.constant 0 : index
    %5 = vector.load %arg3[%c0_4, %c0_5] : memref<1x96xf32, #tpu.memory_space<vmem>>, vector<1x96xf32>
    %6 = vector.broadcast %5 : vector<1x96xf32> to vector<8x96xf32>
    %7 = arith.addf %4, %6 : vector<8x96xf32>
    %c0_6 = arith.constant 0 : index
    %c0_7 = arith.constant 0 : index
    %8 = vector.load %arg4[%c0_6, %c0_7] : memref<32x32xf32, #tpu.memory_space<vmem>>, vector<32x32xf32>
    %cst_8 = arith.constant 0.000000e+00 : f32
    %9 = vector.broadcast %cst_8 : f32 to vector<8x32xf32>
    %10 = vector.extract_strided_slice %7 {offsets = [0, 0], sizes = [8, 8], strides = [1, 1]} : vector<8x96xf32> to vector<8x8xf32>
    %11 = arith.truncf %10 : vector<8x8xf32> to vector<8x8xbf16>
    %12 = vector.extract_strided_slice %7 {offsets = [0, 32], sizes = [8, 8], strides = [1, 1]} : vector<8x96xf32> to vector<8x8xf32>
    %13 = arith.truncf %12 : vector<8x8xf32> to vector<8x8xbf16>
    %14 = vector.extract_strided_slice %7 {offsets = [0, 64], sizes = [8, 8], strides = [1, 1]} : vector<8x96xf32> to vector<8x8xf32>
    %15 = arith.truncf %14 : vector<8x8xf32> to vector<8x8xbf16>
    %cst_9 = arith.constant dense<0.000000e+00> : vector<8x8xf32>
    %16 = tpu.matmul %11, %13, %cst_9 {dimension_numbers = #tpu.dot_dimension_numbers<[1], [1], [0], [0], [0, 0, 1, 0], [], []>} : vector<8x8xbf16>, vector<8x8xbf16>, vector<8x8xf32> -> vector<8x8xf32>
    %cst_10 = arith.constant dense<0xFF800000> : vector<8xf32>
    %17 = vector.multi_reduction <maximumf>, %16, %cst_10 [1] : vector<8x8xf32> to vector<8xf32>
    %18 = vector.shape_cast %17 : vector<8xf32> to vector<8x1xf32>
    %19 = vector.broadcast %18 : vector<8x1xf32> to vector<8x8xf32>
    %20 = arith.subf %16, %19 : vector<8x8xf32>
    %21 = math.exp %20 : vector<8x8xf32>
    %cst_11 = arith.constant dense<0.000000e+00> : vector<8xf32>
    %22 = vector.multi_reduction <add>, %21, %cst_11 [1] : vector<8x8xf32> to vector<8xf32>
    %23 = vector.shape_cast %22 : vector<8xf32> to vector<8x1xf32>
    %24 = tpu.reciprocal %23 {approx = true} : vector<8x1xf32> -> vector<8x1xf32>
    %25 = vector.broadcast %24 : vector<8x1xf32> to vector<8x8xf32>
    %26 = arith.mulf %21, %25 : vector<8x8xf32>
    %27 = arith.truncf %26 : vector<8x8xf32> to vector<8x8xbf16>
    %cst_12 = arith.constant dense<0.000000e+00> : vector<8x8xf32>
    %28 = tpu.matmul %27, %15, %cst_12 {dimension_numbers = #tpu.dot_dimension_numbers<[1], [0], [0], [1], [0, 0, 1, 1], [], []>} : vector<8x8xbf16>, vector<8x8xbf16>, vector<8x8xf32> -> vector<8x8xf32>
    %29 = vector.extract_strided_slice %8 {offsets = [0, 0], sizes = [8, 32], strides = [1, 1]} : vector<32x32xf32> to vector<8x32xf32>
    %30 = arith.truncf %29 : vector<8x32xf32> to vector<8x32xbf16>
    %31 = arith.truncf %28 : vector<8x8xf32> to vector<8x8xbf16>
    %cst_13 = arith.constant dense<0.000000e+00> : vector<8x32xf32>
    %32 = tpu.matmul %31, %30, %cst_13 {dimension_numbers = #tpu.dot_dimension_numbers<[1], [0], [0], [1], [0, 0, 1, 1], [], []>} : vector<8x8xbf16>, vector<8x32xbf16>, vector<8x32xf32> -> vector<8x32xf32>
    %33 = arith.addf %9, %32 : vector<8x32xf32>
    %34 = vector.extract_strided_slice %7 {offsets = [0, 8], sizes = [8, 8], strides = [1, 1]} : vector<8x96xf32> to vector<8x8xf32>
    %35 = arith.truncf %34 : vector<8x8xf32> to vector<8x8xbf16>
    %36 = vector.extract_strided_slice %7 {offsets = [0, 40], sizes = [8, 8], strides = [1, 1]} : vector<8x96xf32> to vector<8x8xf32>
    %37 = arith.truncf %36 : vector<8x8xf32> to vector<8x8xbf16>
    %38 = vector.extract_strided_slice %7 {offsets = [0, 72], sizes = [8, 8], strides = [1, 1]} : vector<8x96xf32> to vector<8x8xf32>
    %39 = arith.truncf %38 : vector<8x8xf32> to vector<8x8xbf16>
    %cst_14 = arith.constant dense<0.000000e+00> : vector<8x8xf32>
    %40 = tpu.matmul %35, %37, %cst_14 {dimension_numbers = #tpu.dot_dimension_numbers<[1], [1], [0], [0], [0, 0, 1, 0], [], []>} : vector<8x8xbf16>, vector<8x8xbf16>, vector<8x8xf32> -> vector<8x8xf32>
    %cst_15 = arith.constant dense<0xFF800000> : vector<8xf32>
    %41 = vector.multi_reduction <maximumf>, %40, %cst_15 [1] : vector<8x8xf32> to vector<8xf32>
    %42 = vector.shape_cast %41 : vector<8xf32> to vector<8x1xf32>
    %43 = vector.broadcast %42 : vector<8x1xf32> to vector<8x8xf32>
    %44 = arith.subf %40, %43 : vector<8x8xf32>
    %45 = math.exp %44 : vector<8x8xf32>
    %cst_16 = arith.constant dense<0.000000e+00> : vector<8xf32>
    %46 = vector.multi_reduction <add>, %45, %cst_16 [1] : vector<8x8xf32> to vector<8xf32>
    %47 = vector.shape_cast %46 : vector<8xf32> to vector<8x1xf32>
    %48 = tpu.reciprocal %47 {approx = true} : vector<8x1xf32> -> vector<8x1xf32>
    %49 = vector.broadcast %48 : vector<8x1xf32> to vector<8x8xf32>
    %50 = arith.mulf %45, %49 : vector<8x8xf32>
    %51 = arith.truncf %50 : vector<8x8xf32> to vector<8x8xbf16>
    %cst_17 = arith.constant dense<0.000000e+00> : vector<8x8xf32>
    %52 = tpu.matmul %51, %39, %cst_17 {dimension_numbers = #tpu.dot_dimension_numbers<[1], [0], [0], [1], [0, 0, 1, 1], [], []>} : vector<8x8xbf16>, vector<8x8xbf16>, vector<8x8xf32> -> vector<8x8xf32>
    %53 = vector.extract_strided_slice %8 {offsets = [8, 0], sizes = [8, 32], strides = [1, 1]} : vector<32x32xf32> to vector<8x32xf32>
    %54 = arith.truncf %53 : vector<8x32xf32> to vector<8x32xbf16>
    %55 = arith.truncf %52 : vector<8x8xf32> to vector<8x8xbf16>
    %cst_18 = arith.constant dense<0.000000e+00> : vector<8x32xf32>
    %56 = tpu.matmul %55, %54, %cst_18 {dimension_numbers = #tpu.dot_dimension_numbers<[1], [0], [0], [1], [0, 0, 1, 1], [], []>} : vector<8x8xbf16>, vector<8x32xbf16>, vector<8x32xf32> -> vector<8x32xf32>
    %57 = arith.addf %33, %56 : vector<8x32xf32>
    %58 = vector.extract_strided_slice %7 {offsets = [0, 16], sizes = [8, 8], strides = [1, 1]} : vector<8x96xf32> to vector<8x8xf32>
    %59 = arith.truncf %58 : vector<8x8xf32> to vector<8x8xbf16>
    %60 = vector.extract_strided_slice %7 {offsets = [0, 48], sizes = [8, 8], strides = [1, 1]} : vector<8x96xf32> to vector<8x8xf32>
    %61 = arith.truncf %60 : vector<8x8xf32> to vector<8x8xbf16>
    %62 = vector.extract_strided_slice %7 {offsets = [0, 80], sizes = [8, 8], strides = [1, 1]} : vector<8x96xf32> to vector<8x8xf32>
    %63 = arith.truncf %62 : vector<8x8xf32> to vector<8x8xbf16>
    %cst_19 = arith.constant dense<0.000000e+00> : vector<8x8xf32>
    %64 = tpu.matmul %59, %61, %cst_19 {dimension_numbers = #tpu.dot_dimension_numbers<[1], [1], [0], [0], [0, 0, 1, 0], [], []>} : vector<8x8xbf16>, vector<8x8xbf16>, vector<8x8xf32> -> vector<8x8xf32>
    %cst_20 = arith.constant dense<0xFF800000> : vector<8xf32>
    %65 = vector.multi_reduction <maximumf>, %64, %cst_20 [1] : vector<8x8xf32> to vector<8xf32>
    %66 = vector.shape_cast %65 : vector<8xf32> to vector<8x1xf32>
    %67 = vector.broadcast %66 : vector<8x1xf32> to vector<8x8xf32>
    %68 = arith.subf %64, %67 : vector<8x8xf32>
    %69 = math.exp %68 : vector<8x8xf32>
    %cst_21 = arith.constant dense<0.000000e+00> : vector<8xf32>
    %70 = vector.multi_reduction <add>, %69, %cst_21 [1] : vector<8x8xf32> to vector<8xf32>
    %71 = vector.shape_cast %70 : vector<8xf32> to vector<8x1xf32>
    %72 = tpu.reciprocal %71 {approx = true} : vector<8x1xf32> -> vector<8x1xf32>
    %73 = vector.broadcast %72 : vector<8x1xf32> to vector<8x8xf32>
    %74 = arith.mulf %69, %73 : vector<8x8xf32>
    %75 = arith.truncf %74 : vector<8x8xf32> to vector<8x8xbf16>
    %cst_22 = arith.constant dense<0.000000e+00> : vector<8x8xf32>
    %76 = tpu.matmul %75, %63, %cst_22 {dimension_numbers = #tpu.dot_dimension_numbers<[1], [0], [0], [1], [0, 0, 1, 1], [], []>} : vector<8x8xbf16>, vector<8x8xbf16>, vector<8x8xf32> -> vector<8x8xf32>
    %77 = vector.extract_strided_slice %8 {offsets = [16, 0], sizes = [8, 32], strides = [1, 1]} : vector<32x32xf32> to vector<8x32xf32>
    %78 = arith.truncf %77 : vector<8x32xf32> to vector<8x32xbf16>
    %79 = arith.truncf %76 : vector<8x8xf32> to vector<8x8xbf16>
    %cst_23 = arith.constant dense<0.000000e+00> : vector<8x32xf32>
    %80 = tpu.matmul %79, %78, %cst_23 {dimension_numbers = #tpu.dot_dimension_numbers<[1], [0], [0], [1], [0, 0, 1, 1], [], []>} : vector<8x8xbf16>, vector<8x32xbf16>, vector<8x32xf32> -> vector<8x32xf32>
    %81 = arith.addf %57, %80 : vector<8x32xf32>
    %82 = vector.extract_strided_slice %7 {offsets = [0, 24], sizes = [8, 8], strides = [1, 1]} : vector<8x96xf32> to vector<8x8xf32>
    %83 = arith.truncf %82 : vector<8x8xf32> to vector<8x8xbf16>
    %84 = vector.extract_strided_slice %7 {offsets = [0, 56], sizes = [8, 8], strides = [1, 1]} : vector<8x96xf32> to vector<8x8xf32>
    %85 = arith.truncf %84 : vector<8x8xf32> to vector<8x8xbf16>
    %86 = vector.extract_strided_slice %7 {offsets = [0, 88], sizes = [8, 8], strides = [1, 1]} : vector<8x96xf32> to vector<8x8xf32>
    %87 = arith.truncf %86 : vector<8x8xf32> to vector<8x8xbf16>
    %cst_24 = arith.constant dense<0.000000e+00> : vector<8x8xf32>
    %88 = tpu.matmul %83, %85, %cst_24 {dimension_numbers = #tpu.dot_dimension_numbers<[1], [1], [0], [0], [0, 0, 1, 0], [], []>} : vector<8x8xbf16>, vector<8x8xbf16>, vector<8x8xf32> -> vector<8x8xf32>
    %cst_25 = arith.constant dense<0xFF800000> : vector<8xf32>
    %89 = vector.multi_reduction <maximumf>, %88, %cst_25 [1] : vector<8x8xf32> to vector<8xf32>
    %90 = vector.shape_cast %89 : vector<8xf32> to vector<8x1xf32>
    %91 = vector.broadcast %90 : vector<8x1xf32> to vector<8x8xf32>
    %92 = arith.subf %88, %91 : vector<8x8xf32>
    %93 = math.exp %92 : vector<8x8xf32>
    %cst_26 = arith.constant dense<0.000000e+00> : vector<8xf32>
    %94 = vector.multi_reduction <add>, %93, %cst_26 [1] : vector<8x8xf32> to vector<8xf32>
    %95 = vector.shape_cast %94 : vector<8xf32> to vector<8x1xf32>
    %96 = tpu.reciprocal %95 {approx = true} : vector<8x1xf32> -> vector<8x1xf32>
    %97 = vector.broadcast %96 : vector<8x1xf32> to vector<8x8xf32>
    %98 = arith.mulf %93, %97 : vector<8x8xf32>
    %99 = arith.truncf %98 : vector<8x8xf32> to vector<8x8xbf16>
    %cst_27 = arith.constant dense<0.000000e+00> : vector<8x8xf32>
    %100 = tpu.matmul %99, %87, %cst_27 {dimension_numbers = #tpu.dot_dimension_numbers<[1], [0], [0], [1], [0, 0, 1, 1], [], []>} : vector<8x8xbf16>, vector<8x8xbf16>, vector<8x8xf32> -> vector<8x8xf32>
    %101 = vector.extract_strided_slice %8 {offsets = [24, 0], sizes = [8, 32], strides = [1, 1]} : vector<32x32xf32> to vector<8x32xf32>
    %102 = arith.truncf %101 : vector<8x32xf32> to vector<8x32xbf16>
    %103 = arith.truncf %100 : vector<8x8xf32> to vector<8x8xbf16>
    %cst_28 = arith.constant dense<0.000000e+00> : vector<8x32xf32>
    %104 = tpu.matmul %103, %102, %cst_28 {dimension_numbers = #tpu.dot_dimension_numbers<[1], [0], [0], [1], [0, 0, 1, 1], [], []>} : vector<8x8xbf16>, vector<8x32xbf16>, vector<8x32xf32> -> vector<8x32xf32>
    %105 = arith.addf %81, %104 : vector<8x32xf32>
    %c0_29 = arith.constant 0 : index
    %c0_30 = arith.constant 0 : index
    %106 = vector.load %arg5[%c0_29, %c0_30] : memref<1x32xf32, #tpu.memory_space<vmem>>, vector<1x32xf32>
    %107 = vector.broadcast %106 : vector<1x32xf32> to vector<8x32xf32>
    %108 = arith.addf %105, %107 : vector<8x32xf32>
    %c0_31 = arith.constant 0 : index
    %c0_32 = arith.constant 0 : index
    %c0_33 = arith.constant 0 : index
    %109 = vector.load %arg6[%c0_31, %c0_32, %c0_33] : memref<1x8x32xf32, #tpu.memory_space<vmem>>, vector<1x8x32xf32>
    %110 = vector.shape_cast %109 : vector<1x8x32xf32> to vector<8x32xf32>
    %111 = vector.shape_cast %108 : vector<8x32xf32> to vector<1x8x32xf32>
    tpu.vector_store %arg6[%c0_31, %c0_32, %c0_33], %111 {strides = array<i32>} : memref<1x8x32xf32, #tpu.memory_space<vmem>>, vector<1x8x32xf32>,
    return
  }
  func.func @transform_0(%arg0: i32) -> (i32, i32, i32) {
    %c0_i32 = arith.constant 0 : i32
    %c0_i32_0 = arith.constant 0 : i32
    %c0_i32_1 = arith.constant 0 : i32
    return %arg0, %c0_i32, %c0_i32_0 : i32, i32, i32
  }
  func.func @transform_1(%arg0: i32) -> (i32, i32) {
    %c0_i32 = arith.constant 0 : i32
    %c0_i32_0 = arith.constant 0 : i32
    %c0_i32_1 = arith.constant 0 : i32
    return %c0_i32, %c0_i32_0 : i32, i32
  }
  func.func @transform_2(%arg0: i32) -> (i32, i32) {
    %c0_i32 = arith.constant 0 : i32
    %c0_i32_0 = arith.constant 0 : i32
    %c0_i32_1 = arith.constant 0 : i32
    return %c0_i32, %c0_i32_0 : i32, i32
  }
  func.func @transform_3(%arg0: i32) -> (i32, i32) {
    %c0_i32 = arith.constant 0 : i32
    %c0_i32_0 = arith.constant 0 : i32
    %c0_i32_1 = arith.constant 0 : i32
    return %c0_i32, %c0_i32_0 : i32, i32
  }
  func.func @transform_4(%arg0: i32) -> (i32, i32) {
    %c0_i32 = arith.constant 0 : i32
    %c0_i32_0 = arith.constant 0 : i32
    %c0_i32_1 = arith.constant 0 : i32
    return %c0_i32, %c0_i32_0 : i32, i32
  }
  func.func @transform_5(%arg0: i32) -> (i32, i32, i32) {
    %c0_i32 = arith.constant 0 : i32
    %c0_i32_0 = arith.constant 0 : i32
    %c0_i32_1 = arith.constant 0 : i32
    return %arg0, %c0_i32, %c0_i32_0 : i32, i32, i32
  }
}

module attributes {stable_mosaic.version = 11 : i64} {
  func.func @_cross_attn_kernel(%arg0: i32, %arg1: memref<1x8x32xf32, #tpu.memory_space<vmem>>, %arg2: memref<1x16x32xf32, #tpu.memory_space<vmem>>, %arg3: memref<32x32xbf16, #tpu.memory_space<vmem>>, %arg4: memref<1x32xf32, #tpu.memory_space<vmem>>, %arg5: memref<32x64xbf16, #tpu.memory_space<vmem>>, %arg6: memref<1x64xf32, #tpu.memory_space<vmem>>, %arg7: memref<32x32xf32, #tpu.memory_space<vmem>>, %arg8: memref<1x32xf32, #tpu.memory_space<vmem>>, %arg9: memref<1x8x32xf32, #tpu.memory_space<vmem>>, %arg10: memref<1x8x16xf32, #tpu.memory_space<vmem>>) attributes {dimension_semantics = [#tpu.dimension_semantics<parallel>], iteration_bounds = array<i64: 2>, scalar_prefetch = 0 : i64, scratch_operands = 0 : i64, tpu.core_type = #tpu.core_type<tc>, window_params = [{transform_indices = @transform_0, window_bounds = array<i64: 1, 8, 32>}, {transform_indices = @transform_1, window_bounds = array<i64: 1, 16, 32>}, {pipeline_mode = #tpu.pipeline_mode<synchronous>, transform_indices = @transform_2, window_bounds = array<i64: 32, 32>}, {pipeline_mode = #tpu.pipeline_mode<synchronous>, transform_indices = @transform_3, window_bounds = array<i64: 1, 32>}, {pipeline_mode = #tpu.pipeline_mode<synchronous>, transform_indices = @transform_4, window_bounds = array<i64: 32, 64>}, {pipeline_mode = #tpu.pipeline_mode<synchronous>, transform_indices = @transform_5, window_bounds = array<i64: 1, 64>}, {pipeline_mode = #tpu.pipeline_mode<synchronous>, transform_indices = @transform_6, window_bounds = array<i64: 32, 32>}, {pipeline_mode = #tpu.pipeline_mode<synchronous>, transform_indices = @transform_7, window_bounds = array<i64: 1, 32>}, {transform_indices = @transform_8, window_bounds = array<i64: 1, 8, 32>}, {transform_indices = @transform_9, window_bounds = array<i64: 1, 8, 16>}]} {
    %c0 = arith.constant 0 : index
    %c0_0 = arith.constant 0 : index
    %c0_1 = arith.constant 0 : index
    %0 = vector.load %arg1[%c0, %c0_0, %c0_1] : memref<1x8x32xf32, #tpu.memory_space<vmem>>, vector<1x8x32xf32>
    %1 = vector.shape_cast %0 : vector<1x8x32xf32> to vector<8x32xf32>
    %2 = arith.truncf %1 : vector<8x32xf32> to vector<8x32xbf16>
    %c0_2 = arith.constant 0 : index
    %c0_3 = arith.constant 0 : index
    %c0_4 = arith.constant 0 : index
    %3 = vector.load %arg2[%c0_2, %c0_3, %c0_4] : memref<1x16x32xf32, #tpu.memory_space<vmem>>, vector<1x16x32xf32>
    %4 = vector.shape_cast %3 : vector<1x16x32xf32> to vector<16x32xf32>
    %5 = arith.truncf %4 : vector<16x32xf32> to vector<16x32xbf16>
    %c0_5 = arith.constant 0 : index
    %c0_6 = arith.constant 0 : index
    %6 = vector.load %arg3[%c0_5, %c0_6] : memref<32x32xbf16, #tpu.memory_space<vmem>>, vector<32x32xbf16>
    %cst = arith.constant dense<0.000000e+00> : vector<8x32xf32>
    %7 = tpu.matmul %2, %6, %cst {dimension_numbers = #tpu.dot_dimension_numbers<[1], [0], [0], [1], [0, 0, 1, 1], [], []>} : vector<8x32xbf16>, vector<32x32xbf16>, vector<8x32xf32> -> vector<8x32xf32>
    %c0_7 = arith.constant 0 : index
    %c0_8 = arith.constant 0 : index
    %8 = vector.load %arg4[%c0_7, %c0_8] : memref<1x32xf32, #tpu.memory_space<vmem>>, vector<1x32xf32>
    %9 = vector.broadcast %8 : vector<1x32xf32> to vector<8x32xf32>
    %10 = arith.addf %7, %9 : vector<8x32xf32>
    %c0_9 = arith.constant 0 : index
    %c0_10 = arith.constant 0 : index
    %11 = vector.load %arg5[%c0_9, %c0_10] : memref<32x64xbf16, #tpu.memory_space<vmem>>, vector<32x64xbf16>
    %cst_11 = arith.constant dense<0.000000e+00> : vector<16x64xf32>
    %12 = tpu.matmul %5, %11, %cst_11 {dimension_numbers = #tpu.dot_dimension_numbers<[1], [0], [0], [1], [0, 0, 1, 1], [], []>} : vector<16x32xbf16>, vector<32x64xbf16>, vector<16x64xf32> -> vector<16x64xf32>
    %c0_12 = arith.constant 0 : index
    %c0_13 = arith.constant 0 : index
    %13 = vector.load %arg6[%c0_12, %c0_13] : memref<1x64xf32, #tpu.memory_space<vmem>>, vector<1x64xf32>
    %14 = vector.broadcast %13 : vector<1x64xf32> to vector<16x64xf32>
    %15 = arith.addf %12, %14 : vector<16x64xf32>
    %c0_14 = arith.constant 0 : index
    %c0_15 = arith.constant 0 : index
    %16 = vector.load %arg7[%c0_14, %c0_15] : memref<32x32xf32, #tpu.memory_space<vmem>>, vector<32x32xf32>
    %cst_16 = arith.constant 0.000000e+00 : f32
    %17 = vector.broadcast %cst_16 : f32 to vector<8x32xf32>
    %cst_17 = arith.constant 0.000000e+00 : f32
    %18 = vector.broadcast %cst_17 : f32 to vector<8x16xf32>
    %19 = vector.extract_strided_slice %10 {offsets = [0, 0], sizes = [8, 8], strides = [1, 1]} : vector<8x32xf32> to vector<8x8xf32>
    %20 = arith.truncf %19 : vector<8x8xf32> to vector<8x8xbf16>
    %21 = vector.extract_strided_slice %15 {offsets = [0, 0], sizes = [16, 8], strides = [1, 1]} : vector<16x64xf32> to vector<16x8xf32>
    %22 = arith.truncf %21 : vector<16x8xf32> to vector<16x8xbf16>
    %23 = vector.extract_strided_slice %15 {offsets = [0, 32], sizes = [16, 8], strides = [1, 1]} : vector<16x64xf32> to vector<16x8xf32>
    %24 = arith.truncf %23 : vector<16x8xf32> to vector<16x8xbf16>
    %cst_18 = arith.constant dense<0.000000e+00> : vector<8x16xf32>
    %25 = tpu.matmul %20, %22, %cst_18 {dimension_numbers = #tpu.dot_dimension_numbers<[1], [1], [0], [0], [0, 0, 1, 0], [], []>} : vector<8x8xbf16>, vector<16x8xbf16>, vector<8x16xf32> -> vector<8x16xf32>
    %cst_19 = arith.constant dense<0xFF800000> : vector<8xf32>
    %26 = vector.multi_reduction <maximumf>, %25, %cst_19 [1] : vector<8x16xf32> to vector<8xf32>
    %27 = vector.shape_cast %26 : vector<8xf32> to vector<8x1xf32>
    %28 = vector.broadcast %27 : vector<8x1xf32> to vector<8x16xf32>
    %29 = arith.subf %25, %28 : vector<8x16xf32>
    %30 = math.exp %29 : vector<8x16xf32>
    %cst_20 = arith.constant dense<0.000000e+00> : vector<8xf32>
    %31 = vector.multi_reduction <add>, %30, %cst_20 [1] : vector<8x16xf32> to vector<8xf32>
    %32 = vector.shape_cast %31 : vector<8xf32> to vector<8x1xf32>
    %33 = tpu.reciprocal %32 {approx = true} : vector<8x1xf32> -> vector<8x1xf32>
    %34 = vector.broadcast %33 : vector<8x1xf32> to vector<8x16xf32>
    %35 = arith.mulf %30, %34 : vector<8x16xf32>
    %36 = arith.addf %18, %35 : vector<8x16xf32>
    %37 = arith.truncf %35 : vector<8x16xf32> to vector<8x16xbf16>
    %cst_21 = arith.constant dense<0.000000e+00> : vector<8x8xf32>
    %38 = tpu.matmul %37, %24, %cst_21 {dimension_numbers = #tpu.dot_dimension_numbers<[1], [0], [0], [1], [0, 0, 1, 1], [], []>} : vector<8x16xbf16>, vector<16x8xbf16>, vector<8x8xf32> -> vector<8x8xf32>
    %39 = vector.extract_strided_slice %16 {offsets = [0, 0], sizes = [8, 32], strides = [1, 1]} : vector<32x32xf32> to vector<8x32xf32>
    %40 = arith.truncf %39 : vector<8x32xf32> to vector<8x32xbf16>
    %41 = arith.truncf %38 : vector<8x8xf32> to vector<8x8xbf16>
    %cst_22 = arith.constant dense<0.000000e+00> : vector<8x32xf32>
    %42 = tpu.matmul %41, %40, %cst_22 {dimension_numbers = #tpu.dot_dimension_numbers<[1], [0], [0], [1], [0, 0, 1, 1], [], []>} : vector<8x8xbf16>, vector<8x32xbf16>, vector<8x32xf32> -> vector<8x32xf32>
    %43 = arith.addf %17, %42 : vector<8x32xf32>
    %44 = vector.extract_strided_slice %10 {offsets = [0, 8], sizes = [8, 8], strides = [1, 1]} : vector<8x32xf32> to vector<8x8xf32>
    %45 = arith.truncf %44 : vector<8x8xf32> to vector<8x8xbf16>
    %46 = vector.extract_strided_slice %15 {offsets = [0, 8], sizes = [16, 8], strides = [1, 1]} : vector<16x64xf32> to vector<16x8xf32>
    %47 = arith.truncf %46 : vector<16x8xf32> to vector<16x8xbf16>
    %48 = vector.extract_strided_slice %15 {offsets = [0, 40], sizes = [16, 8], strides = [1, 1]} : vector<16x64xf32> to vector<16x8xf32>
    %49 = arith.truncf %48 : vector<16x8xf32> to vector<16x8xbf16>
    %cst_23 = arith.constant dense<0.000000e+00> : vector<8x16xf32>
    %50 = tpu.matmul %45, %47, %cst_23 {dimension_numbers = #tpu.dot_dimension_numbers<[1], [1], [0], [0], [0, 0, 1, 0], [], []>} : vector<8x8xbf16>, vector<16x8xbf16>, vector<8x16xf32> -> vector<8x16xf32>
    %cst_24 = arith.constant dense<0xFF800000> : vector<8xf32>
    %51 = vector.multi_reduction <maximumf>, %50, %cst_24 [1] : vector<8x16xf32> to vector<8xf32>
    %52 = vector.shape_cast %51 : vector<8xf32> to vector<8x1xf32>
    %53 = vector.broadcast %52 : vector<8x1xf32> to vector<8x16xf32>
    %54 = arith.subf %50, %53 : vector<8x16xf32>
    %55 = math.exp %54 : vector<8x16xf32>
    %cst_25 = arith.constant dense<0.000000e+00> : vector<8xf32>
    %56 = vector.multi_reduction <add>, %55, %cst_25 [1] : vector<8x16xf32> to vector<8xf32>
    %57 = vector.shape_cast %56 : vector<8xf32> to vector<8x1xf32>
    %58 = tpu.reciprocal %57 {approx = true} : vector<8x1xf32> -> vector<8x1xf32>
    %59 = vector.broadcast %58 : vector<8x1xf32> to vector<8x16xf32>
    %60 = arith.mulf %55, %59 : vector<8x16xf32>
    %61 = arith.addf %36, %60 : vector<8x16xf32>
    %62 = arith.truncf %60 : vector<8x16xf32> to vector<8x16xbf16>
    %cst_26 = arith.constant dense<0.000000e+00> : vector<8x8xf32>
    %63 = tpu.matmul %62, %49, %cst_26 {dimension_numbers = #tpu.dot_dimension_numbers<[1], [0], [0], [1], [0, 0, 1, 1], [], []>} : vector<8x16xbf16>, vector<16x8xbf16>, vector<8x8xf32> -> vector<8x8xf32>
    %64 = vector.extract_strided_slice %16 {offsets = [8, 0], sizes = [8, 32], strides = [1, 1]} : vector<32x32xf32> to vector<8x32xf32>
    %65 = arith.truncf %64 : vector<8x32xf32> to vector<8x32xbf16>
    %66 = arith.truncf %63 : vector<8x8xf32> to vector<8x8xbf16>
    %cst_27 = arith.constant dense<0.000000e+00> : vector<8x32xf32>
    %67 = tpu.matmul %66, %65, %cst_27 {dimension_numbers = #tpu.dot_dimension_numbers<[1], [0], [0], [1], [0, 0, 1, 1], [], []>} : vector<8x8xbf16>, vector<8x32xbf16>, vector<8x32xf32> -> vector<8x32xf32>
    %68 = arith.addf %43, %67 : vector<8x32xf32>
    %69 = vector.extract_strided_slice %10 {offsets = [0, 16], sizes = [8, 8], strides = [1, 1]} : vector<8x32xf32> to vector<8x8xf32>
    %70 = arith.truncf %69 : vector<8x8xf32> to vector<8x8xbf16>
    %71 = vector.extract_strided_slice %15 {offsets = [0, 16], sizes = [16, 8], strides = [1, 1]} : vector<16x64xf32> to vector<16x8xf32>
    %72 = arith.truncf %71 : vector<16x8xf32> to vector<16x8xbf16>
    %73 = vector.extract_strided_slice %15 {offsets = [0, 48], sizes = [16, 8], strides = [1, 1]} : vector<16x64xf32> to vector<16x8xf32>
    %74 = arith.truncf %73 : vector<16x8xf32> to vector<16x8xbf16>
    %cst_28 = arith.constant dense<0.000000e+00> : vector<8x16xf32>
    %75 = tpu.matmul %70, %72, %cst_28 {dimension_numbers = #tpu.dot_dimension_numbers<[1], [1], [0], [0], [0, 0, 1, 0], [], []>} : vector<8x8xbf16>, vector<16x8xbf16>, vector<8x16xf32> -> vector<8x16xf32>
    %cst_29 = arith.constant dense<0xFF800000> : vector<8xf32>
    %76 = vector.multi_reduction <maximumf>, %75, %cst_29 [1] : vector<8x16xf32> to vector<8xf32>
    %77 = vector.shape_cast %76 : vector<8xf32> to vector<8x1xf32>
    %78 = vector.broadcast %77 : vector<8x1xf32> to vector<8x16xf32>
    %79 = arith.subf %75, %78 : vector<8x16xf32>
    %80 = math.exp %79 : vector<8x16xf32>
    %cst_30 = arith.constant dense<0.000000e+00> : vector<8xf32>
    %81 = vector.multi_reduction <add>, %80, %cst_30 [1] : vector<8x16xf32> to vector<8xf32>
    %82 = vector.shape_cast %81 : vector<8xf32> to vector<8x1xf32>
    %83 = tpu.reciprocal %82 {approx = true} : vector<8x1xf32> -> vector<8x1xf32>
    %84 = vector.broadcast %83 : vector<8x1xf32> to vector<8x16xf32>
    %85 = arith.mulf %80, %84 : vector<8x16xf32>
    %86 = arith.addf %61, %85 : vector<8x16xf32>
    %87 = arith.truncf %85 : vector<8x16xf32> to vector<8x16xbf16>
    %cst_31 = arith.constant dense<0.000000e+00> : vector<8x8xf32>
    %88 = tpu.matmul %87, %74, %cst_31 {dimension_numbers = #tpu.dot_dimension_numbers<[1], [0], [0], [1], [0, 0, 1, 1], [], []>} : vector<8x16xbf16>, vector<16x8xbf16>, vector<8x8xf32> -> vector<8x8xf32>
    %89 = vector.extract_strided_slice %16 {offsets = [16, 0], sizes = [8, 32], strides = [1, 1]} : vector<32x32xf32> to vector<8x32xf32>
    %90 = arith.truncf %89 : vector<8x32xf32> to vector<8x32xbf16>
    %91 = arith.truncf %88 : vector<8x8xf32> to vector<8x8xbf16>
    %cst_32 = arith.constant dense<0.000000e+00> : vector<8x32xf32>
    %92 = tpu.matmul %91, %90, %cst_32 {dimension_numbers = #tpu.dot_dimension_numbers<[1], [0], [0], [1], [0, 0, 1, 1], [], []>} : vector<8x8xbf16>, vector<8x32xbf16>, vector<8x32xf32> -> vector<8x32xf32>
    %93 = arith.addf %68, %92 : vector<8x32xf32>
    %94 = vector.extract_strided_slice %10 {offsets = [0, 24], sizes = [8, 8], strides = [1, 1]} : vector<8x32xf32> to vector<8x8xf32>
    %95 = arith.truncf %94 : vector<8x8xf32> to vector<8x8xbf16>
    %96 = vector.extract_strided_slice %15 {offsets = [0, 24], sizes = [16, 8], strides = [1, 1]} : vector<16x64xf32> to vector<16x8xf32>
    %97 = arith.truncf %96 : vector<16x8xf32> to vector<16x8xbf16>
    %98 = vector.extract_strided_slice %15 {offsets = [0, 56], sizes = [16, 8], strides = [1, 1]} : vector<16x64xf32> to vector<16x8xf32>
    %99 = arith.truncf %98 : vector<16x8xf32> to vector<16x8xbf16>
    %cst_33 = arith.constant dense<0.000000e+00> : vector<8x16xf32>
    %100 = tpu.matmul %95, %97, %cst_33 {dimension_numbers = #tpu.dot_dimension_numbers<[1], [1], [0], [0], [0, 0, 1, 0], [], []>} : vector<8x8xbf16>, vector<16x8xbf16>, vector<8x16xf32> -> vector<8x16xf32>
    %cst_34 = arith.constant dense<0xFF800000> : vector<8xf32>
    %101 = vector.multi_reduction <maximumf>, %100, %cst_34 [1] : vector<8x16xf32> to vector<8xf32>
    %102 = vector.shape_cast %101 : vector<8xf32> to vector<8x1xf32>
    %103 = vector.broadcast %102 : vector<8x1xf32> to vector<8x16xf32>
    %104 = arith.subf %100, %103 : vector<8x16xf32>
    %105 = math.exp %104 : vector<8x16xf32>
    %cst_35 = arith.constant dense<0.000000e+00> : vector<8xf32>
    %106 = vector.multi_reduction <add>, %105, %cst_35 [1] : vector<8x16xf32> to vector<8xf32>
    %107 = vector.shape_cast %106 : vector<8xf32> to vector<8x1xf32>
    %108 = tpu.reciprocal %107 {approx = true} : vector<8x1xf32> -> vector<8x1xf32>
    %109 = vector.broadcast %108 : vector<8x1xf32> to vector<8x16xf32>
    %110 = arith.mulf %105, %109 : vector<8x16xf32>
    %111 = arith.addf %86, %110 : vector<8x16xf32>
    %112 = arith.truncf %110 : vector<8x16xf32> to vector<8x16xbf16>
    %cst_36 = arith.constant dense<0.000000e+00> : vector<8x8xf32>
    %113 = tpu.matmul %112, %99, %cst_36 {dimension_numbers = #tpu.dot_dimension_numbers<[1], [0], [0], [1], [0, 0, 1, 1], [], []>} : vector<8x16xbf16>, vector<16x8xbf16>, vector<8x8xf32> -> vector<8x8xf32>
    %114 = vector.extract_strided_slice %16 {offsets = [24, 0], sizes = [8, 32], strides = [1, 1]} : vector<32x32xf32> to vector<8x32xf32>
    %115 = arith.truncf %114 : vector<8x32xf32> to vector<8x32xbf16>
    %116 = arith.truncf %113 : vector<8x8xf32> to vector<8x8xbf16>
    %cst_37 = arith.constant dense<0.000000e+00> : vector<8x32xf32>
    %117 = tpu.matmul %116, %115, %cst_37 {dimension_numbers = #tpu.dot_dimension_numbers<[1], [0], [0], [1], [0, 0, 1, 1], [], []>} : vector<8x8xbf16>, vector<8x32xbf16>, vector<8x32xf32> -> vector<8x32xf32>
    %118 = arith.addf %93, %117 : vector<8x32xf32>
    %c0_38 = arith.constant 0 : index
    %c0_39 = arith.constant 0 : index
    %119 = vector.load %arg8[%c0_38, %c0_39] : memref<1x32xf32, #tpu.memory_space<vmem>>, vector<1x32xf32>
    %120 = vector.broadcast %119 : vector<1x32xf32> to vector<8x32xf32>
    %121 = arith.addf %118, %120 : vector<8x32xf32>
    %c0_40 = arith.constant 0 : index
    %c0_41 = arith.constant 0 : index
    %c0_42 = arith.constant 0 : index
    %122 = vector.load %arg9[%c0_40, %c0_41, %c0_42] : memref<1x8x32xf32, #tpu.memory_space<vmem>>, vector<1x8x32xf32>
    %123 = vector.shape_cast %122 : vector<1x8x32xf32> to vector<8x32xf32>
    %124 = vector.shape_cast %121 : vector<8x32xf32> to vector<1x8x32xf32>
    tpu.vector_store %arg9[%c0_40, %c0_41, %c0_42], %124 {strides = array<i32>} : memref<1x8x32xf32, #tpu.memory_space<vmem>>, vector<1x8x32xf32>,
    %cst_43 = arith.constant 2.500000e-01 : f32
    %125 = vector.broadcast %cst_43 : f32 to vector<8x16xf32>
    %126 = arith.mulf %111, %125 : vector<8x16xf32>
    %c0_44 = arith.constant 0 : index
    %c0_45 = arith.constant 0 : index
    %c0_46 = arith.constant 0 : index
    %127 = vector.load %arg10[%c0_44, %c0_45, %c0_46] : memref<1x8x16xf32, #tpu.memory_space<vmem>>, vector<1x8x16xf32>
    %128 = vector.shape_cast %127 : vector<1x8x16xf32> to vector<8x16xf32>
    %129 = vector.shape_cast %126 : vector<8x16xf32> to vector<1x8x16xf32>
    tpu.vector_store %arg10[%c0_44, %c0_45, %c0_46], %129 {strides = array<i32>} : memref<1x8x16xf32, #tpu.memory_space<vmem>>, vector<1x8x16xf32>,
    return
  }
  func.func @transform_0(%arg0: i32) -> (i32, i32, i32) {
    %c0_i32 = arith.constant 0 : i32
    %c0_i32_0 = arith.constant 0 : i32
    %c0_i32_1 = arith.constant 0 : i32
    return %arg0, %c0_i32, %c0_i32_0 : i32, i32, i32
  }
  func.func @transform_1(%arg0: i32) -> (i32, i32, i32) {
    %c0_i32 = arith.constant 0 : i32
    %c0_i32_0 = arith.constant 0 : i32
    %c0_i32_1 = arith.constant 0 : i32
    return %arg0, %c0_i32, %c0_i32_0 : i32, i32, i32
  }
  func.func @transform_2(%arg0: i32) -> (i32, i32) {
    %c0_i32 = arith.constant 0 : i32
    %c0_i32_0 = arith.constant 0 : i32
    %c0_i32_1 = arith.constant 0 : i32
    return %c0_i32, %c0_i32_0 : i32, i32
  }
  func.func @transform_3(%arg0: i32) -> (i32, i32) {
    %c0_i32 = arith.constant 0 : i32
    %c0_i32_0 = arith.constant 0 : i32
    %c0_i32_1 = arith.constant 0 : i32
    return %c0_i32, %c0_i32_0 : i32, i32
  }
  func.func @transform_4(%arg0: i32) -> (i32, i32) {
    %c0_i32 = arith.constant 0 : i32
    %c0_i32_0 = arith.constant 0 : i32
    %c0_i32_1 = arith.constant 0 : i32
    return %c0_i32, %c0_i32_0 : i32, i32
  }
  func.func @transform_5(%arg0: i32) -> (i32, i32) {
    %c0_i32 = arith.constant 0 : i32
    %c0_i32_0 = arith.constant 0 : i32
    %c0_i32_1 = arith.constant 0 : i32
    return %c0_i32, %c0_i32_0 : i32, i32
  }
  func.func @transform_6(%arg0: i32) -> (i32, i32) {
    %c0_i32 = arith.constant 0 : i32
    %c0_i32_0 = arith.constant 0 : i32
    %c0_i32_1 = arith.constant 0 : i32
    return %c0_i32, %c0_i32_0 : i32, i32
  }
  func.func @transform_7(%arg0: i32) -> (i32, i32) {
    %c0_i32 = arith.constant 0 : i32
    %c0_i32_0 = arith.constant 0 : i32
    %c0_i32_1 = arith.constant 0 : i32
    return %c0_i32, %c0_i32_0 : i32, i32
  }
  func.func @transform_8(%arg0: i32) -> (i32, i32, i32) {
    %c0_i32 = arith.constant 0 : i32
    %c0_i32_0 = arith.constant 0 : i32
    %c0_i32_1 = arith.constant 0 : i32
    return %arg0, %c0_i32, %c0_i32_0 : i32, i32, i32
  }
  func.func @transform_9(%arg0: i32) -> (i32, i32, i32) {
    %c0_i32 = arith.constant 0 : i32
    %c0_i32_0 = arith.constant 0 : i32
    %c0_i32_1 = arith.constant 0 : i32
    return %arg0, %c0_i32, %c0_i32_0 : i32, i32, i32
  }
}

module attributes {stable_mosaic.version = 11 : i64} {
  func.func @_ffn_kernel(%arg0: i32, %arg1: memref<16x32xf32, #tpu.memory_space<vmem>>, %arg2: memref<32x64xbf16, #tpu.memory_space<vmem>>, %arg3: memref<1x64xf32, #tpu.memory_space<vmem>>, %arg4: memref<64x32xbf16, #tpu.memory_space<vmem>>, %arg5: memref<1x32xf32, #tpu.memory_space<vmem>>, %arg6: memref<16x32xf32, #tpu.memory_space<vmem>>) attributes {dimension_semantics = [#tpu.dimension_semantics<parallel>], iteration_bounds = array<i64: 1>, scalar_prefetch = 0 : i64, scratch_operands = 0 : i64, tpu.core_type = #tpu.core_type<tc>, window_params = [{transform_indices = @transform_0, window_bounds = array<i64: 16, 32>}, {pipeline_mode = #tpu.pipeline_mode<synchronous>, transform_indices = @transform_1, window_bounds = array<i64: 32, 64>}, {pipeline_mode = #tpu.pipeline_mode<synchronous>, transform_indices = @transform_2, window_bounds = array<i64: 1, 64>}, {pipeline_mode = #tpu.pipeline_mode<synchronous>, transform_indices = @transform_3, window_bounds = array<i64: 64, 32>}, {pipeline_mode = #tpu.pipeline_mode<synchronous>, transform_indices = @transform_4, window_bounds = array<i64: 1, 32>}, {transform_indices = @transform_5, window_bounds = array<i64: 16, 32>}]} {
    %c0 = arith.constant 0 : index
    %c0_0 = arith.constant 0 : index
    %0 = vector.load %arg1[%c0, %c0_0] : memref<16x32xf32, #tpu.memory_space<vmem>>, vector<16x32xf32>
    %1 = arith.truncf %0 : vector<16x32xf32> to vector<16x32xbf16>
    %c0_1 = arith.constant 0 : index
    %c0_2 = arith.constant 0 : index
    %2 = vector.load %arg2[%c0_1, %c0_2] : memref<32x64xbf16, #tpu.memory_space<vmem>>, vector<32x64xbf16>
    %cst = arith.constant dense<0.000000e+00> : vector<16x64xf32>
    %3 = tpu.matmul %1, %2, %cst {dimension_numbers = #tpu.dot_dimension_numbers<[1], [0], [0], [1], [0, 0, 1, 1], [], []>} : vector<16x32xbf16>, vector<32x64xbf16>, vector<16x64xf32> -> vector<16x64xf32>
    %c0_3 = arith.constant 0 : index
    %c0_4 = arith.constant 0 : index
    %4 = vector.load %arg3[%c0_3, %c0_4] : memref<1x64xf32, #tpu.memory_space<vmem>>, vector<1x64xf32>
    %5 = vector.broadcast %4 : vector<1x64xf32> to vector<16x64xf32>
    %6 = arith.addf %3, %5 : vector<16x64xf32>
    %cst_5 = arith.constant 0.000000e+00 : f32
    %7 = vector.broadcast %cst_5 : f32 to vector<16x64xf32>
    %8 = arith.maximumf %6, %7 : vector<16x64xf32>
    %9 = arith.truncf %8 : vector<16x64xf32> to vector<16x64xbf16>
    %c0_6 = arith.constant 0 : index
    %c0_7 = arith.constant 0 : index
    %10 = vector.load %arg4[%c0_6, %c0_7] : memref<64x32xbf16, #tpu.memory_space<vmem>>, vector<64x32xbf16>
    %cst_8 = arith.constant dense<0.000000e+00> : vector<16x32xf32>
    %11 = tpu.matmul %9, %10, %cst_8 {dimension_numbers = #tpu.dot_dimension_numbers<[1], [0], [0], [1], [0, 0, 1, 1], [], []>} : vector<16x64xbf16>, vector<64x32xbf16>, vector<16x32xf32> -> vector<16x32xf32>
    %c0_9 = arith.constant 0 : index
    %c0_10 = arith.constant 0 : index
    %12 = vector.load %arg5[%c0_9, %c0_10] : memref<1x32xf32, #tpu.memory_space<vmem>>, vector<1x32xf32>
    %13 = vector.broadcast %12 : vector<1x32xf32> to vector<16x32xf32>
    %14 = arith.addf %11, %13 : vector<16x32xf32>
    %c0_11 = arith.constant 0 : index
    %c0_12 = arith.constant 0 : index
    %15 = vector.load %arg6[%c0_11, %c0_12] : memref<16x32xf32, #tpu.memory_space<vmem>>, vector<16x32xf32>
    tpu.vector_store %arg6[%c0_11, %c0_12], %14 {strides = array<i32>} : memref<16x32xf32, #tpu.memory_space<vmem>>, vector<16x32xf32>,
    return
  }
  func.func @transform_0(%arg0: i32) -> (i32, i32) {
    %c0_i32 = arith.constant 0 : i32
    %c0_i32_0 = arith.constant 0 : i32
    return %arg0, %c0_i32 : i32, i32
  }
  func.func @transform_1(%arg0: i32) -> (i32, i32) {
    %c0_i32 = arith.constant 0 : i32
    %c0_i32_0 = arith.constant 0 : i32
    %c0_i32_1 = arith.constant 0 : i32
    return %c0_i32, %c0_i32_0 : i32, i32
  }
  func.func @transform_2(%arg0: i32) -> (i32, i32) {
    %c0_i32 = arith.constant 0 : i32
    %c0_i32_0 = arith.constant 0 : i32
    %c0_i32_1 = arith.constant 0 : i32
    return %c0_i32, %c0_i32_0 : i32, i32
  }
  func.func @transform_3(%arg0: i32) -> (i32, i32) {
    %c0_i32 = arith.constant 0 : i32
    %c0_i32_0 = arith.constant 0 : i32
    %c0_i32_1 = arith.constant 0 : i32
    return %c0_i32, %c0_i32_0 : i32, i32
  }
  func.func @transform_4(%arg0: i32) -> (i32, i32) {
    %c0_i32 = arith.constant 0 : i32
    %c0_i32_0 = arith.constant 0 : i32
    %c0_i32_1 = arith.constant 0 : i32
    return %c0_i32, %c0_i32_0 : i32, i32
  }
  func.func @transform_5(%arg0: i32) -> (i32, i32) {
    %c0_i32 = arith.constant 0 : i32
    %c0_i32_0 = arith.constant 0 : i32
    return %arg0, %c0_i32 : i32, i32
  }
}

module attributes {stable_mosaic.version = 11 : i64} {
  func.func @_combine_ln_kernel(%arg0: i32, %arg1: memref<16x32xf32, #tpu.memory_space<vmem>>, %arg2: memref<16x32xf32, #tpu.memory_space<vmem>>, %arg3: memref<16x32xf32, #tpu.memory_space<vmem>>, %arg4: memref<16x32xf32, #tpu.memory_space<vmem>>, %arg5: memref<1x32xf32, #tpu.memory_space<vmem>>, %arg6: memref<1x32xf32, #tpu.memory_space<vmem>>, %arg7: memref<16x32xf32, #tpu.memory_space<vmem>>) attributes {dimension_semantics = [#tpu.dimension_semantics<parallel>], iteration_bounds = array<i64: 1>, scalar_prefetch = 0 : i64, scratch_operands = 0 : i64, tpu.core_type = #tpu.core_type<tc>, window_params = [{transform_indices = @transform_0, window_bounds = array<i64: 16, 32>}, {transform_indices = @transform_1, window_bounds = array<i64: 16, 32>}, {transform_indices = @transform_2, window_bounds = array<i64: 16, 32>}, {transform_indices = @transform_3, window_bounds = array<i64: 16, 32>}, {pipeline_mode = #tpu.pipeline_mode<synchronous>, transform_indices = @transform_4, window_bounds = array<i64: 1, 32>}, {pipeline_mode = #tpu.pipeline_mode<synchronous>, transform_indices = @transform_5, window_bounds = array<i64: 1, 32>}, {transform_indices = @transform_6, window_bounds = array<i64: 16, 32>}]} {
    %c0 = arith.constant 0 : index
    %c0_0 = arith.constant 0 : index
    %0 = vector.load %arg1[%c0, %c0_0] : memref<16x32xf32, #tpu.memory_space<vmem>>, vector<16x32xf32>
    %c0_1 = arith.constant 0 : index
    %c0_2 = arith.constant 0 : index
    %1 = vector.load %arg2[%c0_1, %c0_2] : memref<16x32xf32, #tpu.memory_space<vmem>>, vector<16x32xf32>
    %2 = arith.addf %0, %1 : vector<16x32xf32>
    %c0_3 = arith.constant 0 : index
    %c0_4 = arith.constant 0 : index
    %3 = vector.load %arg3[%c0_3, %c0_4] : memref<16x32xf32, #tpu.memory_space<vmem>>, vector<16x32xf32>
    %4 = arith.addf %2, %3 : vector<16x32xf32>
    %c0_5 = arith.constant 0 : index
    %c0_6 = arith.constant 0 : index
    %5 = vector.load %arg4[%c0_5, %c0_6] : memref<16x32xf32, #tpu.memory_space<vmem>>, vector<16x32xf32>
    %6 = arith.addf %4, %5 : vector<16x32xf32>
    %cst = arith.constant dense<0.000000e+00> : vector<16xf32>
    %7 = vector.multi_reduction <add>, %6, %cst [1] : vector<16x32xf32> to vector<16xf32>
    %8 = vector.shape_cast %7 : vector<16xf32> to vector<16x1xf32>
    %cst_7 = arith.constant 3.200000e+01 : f32
    %9 = vector.broadcast %cst_7 : f32 to vector<16x1xf32>
    %10 = arith.divf %8, %9 : vector<16x1xf32>
    %11 = vector.broadcast %10 : vector<16x1xf32> to vector<16x32xf32>
    %12 = arith.subf %6, %11 : vector<16x32xf32>
    %13 = arith.mulf %12, %12 : vector<16x32xf32>
    %cst_8 = arith.constant dense<0.000000e+00> : vector<16xf32>
    %14 = vector.multi_reduction <add>, %13, %cst_8 [1] : vector<16x32xf32> to vector<16xf32>
    %15 = vector.shape_cast %14 : vector<16xf32> to vector<16x1xf32>
    %cst_9 = arith.constant 3.200000e+01 : f32
    %16 = vector.broadcast %cst_9 : f32 to vector<16x1xf32>
    %17 = arith.divf %15, %16 : vector<16x1xf32>
    %cst_10 = arith.constant 9.99999974E-6 : f32
    %18 = vector.broadcast %cst_10 : f32 to vector<16x1xf32>
    %19 = arith.addf %17, %18 : vector<16x1xf32>
    %20 = math.rsqrt %19 : vector<16x1xf32>
    %21 = vector.broadcast %20 : vector<16x1xf32> to vector<16x32xf32>
    %22 = arith.mulf %12, %21 : vector<16x32xf32>
    %c0_11 = arith.constant 0 : index
    %c0_12 = arith.constant 0 : index
    %23 = vector.load %arg5[%c0_11, %c0_12] : memref<1x32xf32, #tpu.memory_space<vmem>>, vector<1x32xf32>
    %24 = vector.broadcast %23 : vector<1x32xf32> to vector<16x32xf32>
    %25 = arith.mulf %22, %24 : vector<16x32xf32>
    %c0_13 = arith.constant 0 : index
    %c0_14 = arith.constant 0 : index
    %26 = vector.load %arg6[%c0_13, %c0_14] : memref<1x32xf32, #tpu.memory_space<vmem>>, vector<1x32xf32>
    %27 = vector.broadcast %26 : vector<1x32xf32> to vector<16x32xf32>
    %28 = arith.addf %25, %27 : vector<16x32xf32>
    %c0_15 = arith.constant 0 : index
    %c0_16 = arith.constant 0 : index
    %29 = vector.load %arg7[%c0_15, %c0_16] : memref<16x32xf32, #tpu.memory_space<vmem>>, vector<16x32xf32>
    tpu.vector_store %arg7[%c0_15, %c0_16], %28 {strides = array<i32>} : memref<16x32xf32, #tpu.memory_space<vmem>>, vector<16x32xf32>,
    return
  }
  func.func @transform_0(%arg0: i32) -> (i32, i32) {
    %c0_i32 = arith.constant 0 : i32
    %c0_i32_0 = arith.constant 0 : i32
    return %arg0, %c0_i32 : i32, i32
  }
  func.func @transform_1(%arg0: i32) -> (i32, i32) {
    %c0_i32 = arith.constant 0 : i32
    %c0_i32_0 = arith.constant 0 : i32
    return %arg0, %c0_i32 : i32, i32
  }
  func.func @transform_2(%arg0: i32) -> (i32, i32) {
    %c0_i32 = arith.constant 0 : i32
    %c0_i32_0 = arith.constant 0 : i32
    return %arg0, %c0_i32 : i32, i32
  }
  func.func @transform_3(%arg0: i32) -> (i32, i32) {
    %c0_i32 = arith.constant 0 : i32
    %c0_i32_0 = arith.constant 0 : i32
    return %arg0, %c0_i32 : i32, i32
  }
  func.func @transform_4(%arg0: i32) -> (i32, i32) {
    %c0_i32 = arith.constant 0 : i32
    %c0_i32_0 = arith.constant 0 : i32
    %c0_i32_1 = arith.constant 0 : i32
    return %c0_i32, %c0_i32_0 : i32, i32
  }
  func.func @transform_5(%arg0: i32) -> (i32, i32) {
    %c0_i32 = arith.constant 0 : i32
    %c0_i32_0 = arith.constant 0 : i32
    %c0_i32_1 = arith.constant 0 : i32
    return %c0_i32, %c0_i32_0 : i32, i32
  }
  func.func @transform_6(%arg0: i32) -> (i32, i32) {
    %c0_i32 = arith.constant 0 : i32
    %c0_i32_0 = arith.constant 0 : i32
    return %arg0, %c0_i32 : i32, i32
  }
}

</mosaic_0001>

<bundles_post_ra>
// kernel: transformer_combine_decoder_layer.6
= control target key start
LH: loop header
LB: loop body
LE: loop exit
PB: predicated region body
PF: predicated region fallthrough
CT: control target
= control target key end

     0   :  { %vm44_vm0 = vcmask 261120   ;;  %vm101_vm1 = vcmask 523264   ;;  %s228_s1 = inlined_call_operand.vmem [shape: bf16[32,64], index: 1, kind: input, shape index: {}]   ;;  %s229_s0 = inlined_call_operand.vmem [shape: f32[16,32], index: 0, kind: input, shape index: {}]   ;;  %s230_s2 = inlined_call_operand.vmem [shape: f32[1,64], index: 2, kind: input, shape index: {}]   ;;  %s231_s4 = inlined_call_operand.vmem [shape: f32[1,32], index: 4, kind: input, shape index: {}]   ;;  %s232_s3 = inlined_call_operand.vmem [shape: bf16[64,32], index: 3, kind: input, shape index: {}]   ;;  %s233_s5 = inlined_call_operand.vmem [shape: f32[16,32], index: 5, kind: output, shape index: {}]  }
   0x1   :  { %v152_v0 = vld [vmem:[%s228_s1 + $0x8] sm:$0xff]  ;;  %v151_v1 = vld [vmem:[%s228_s1] sm:$0xff]  ;;  %v156_v5 = vld [vmem:[%s232_s3 + $0x18] sm:$0xff] }
   0x2   :  { %54 = vmatpush.bf16.msra.mxu0 %v152_v0  ;;  %v21_v2 = vld [vmem:[%s229_s0] sm:$0xff]  ;;  %v22_v3 = vld [vmem:[%s229_s0 + $0x8] sm:$0xff]  ;;  %109 = vmatpush.bf16.msra.mxu1 %v156_v5  ;;  %v155_v6 = vld [vmem:[%s232_s3 + $0x10] sm:$0xff] }
   0x3   :  { %v23_v4 = vpack.c.bf16 %v22_v3, %v21_v2  ;;  %v154_v7 = vld [vmem:[%s232_s3 + $0x8] sm:$0xff]  ;;  %v153_v8 = vld [vmem:[%s232_s3] sm:$0xff] }
   0x4   :  { %v157_v10 = vld [vmem:[%s230_s2] ss:$0 sm:$0xff] }
   0x5   :  { %v158_v17 = vld [vmem:[%s231_s4] ss:$0 sm:$0xff] }
   0x6   :  { %55 = vmatpush.bf16.msra.mxu0 %v151_v1  ;;  %110 = vmatpush.bf16.msra.mxu1 %v155_v6 }
   0x9   :  { %133 = vmatmul.msk.bf16.vlgmr.msra.gmra.mxu0 %vm44_vm0, %v23_v4 }
   0xa   :  { %111 = vmatpush.bf16.msra.mxu1 %v154_v7 }
   0xe   :  { %112 = vmatpush.bf16.msra.mxu1 %v153_v8 }
  0x86   :  { %v57_v9 = vpop.f32.mrf.mxu0 }
  0x87   :  { %v58_v11 = vadd.f32 %v157_v10, %v57_v9 }
  0x89   :  { %v62_v14 = vmax.f32 %v58_v11, 0.0 }
  0x8e   :  { %v59_v12 = vpop.f32.mrf.mxu0 }
  0x8f   :  { %v60_v13 = vadd.f32 %v157_v10, %v59_v12 }
  0x91   :  { %v63_v15 = vmax.f32 %v60_v13, 0.0 }
  0x93   :  { %v64_v16 = vpack.c.bf16 %v63_v15, %v62_v14 }
  0x95   :  { %150 = vmatmul.msk.bf16.vlgmr.msra.gmra.mxu1 %vm101_vm1, %v64_v16 }
 0x112   :  { %v114_v18 = vpop.f32.mrf.mxu1 }
 0x113   :  { %v115_v19 = vadd.f32 %v158_v17, %v114_v18 }
 0x115   :  { %119 = vst.msk [vmem:[%s233_s5] sm:$0xff] %vm44_vm0, %v115_v19 }
 0x11a   :  { %v116_v20 = vpop.f32.mrf.mxu1 }
 0x11b   :  { %v117_v21 = vadd.f32 %v158_v17, %v116_v20 }
 0x11d   :  { %120 = vst.msk [vmem:[%s233_s5 + $0x8] sm:$0xff] %vm44_vm0, %v117_v21 }

// kernel: transformer_combine_decoder_layer.7
= control target key start
LH: loop header
LB: loop body
LE: loop exit
PB: predicated region body
PF: predicated region fallthrough
CT: control target
= control target key end

     0   :  { %vm37_vm0 = vcmask 261120   ;;  %v116_v16 = vmov 32.0   ;;  %s194_s0 = inlined_call_operand.vmem [shape: f32[16,32], index: 0, kind: input, shape index: {}]   ;;  %s195_s1 = inlined_call_operand.vmem [shape: f32[16,32], index: 1, kind: input, shape index: {}]   ;;  %s196_s2 = inlined_call_operand.vmem [shape: f32[16,32], index: 2, kind: input, shape index: {}]   ;;  %s197_s3 = inlined_call_operand.vmem [shape: f32[16,32], index: 3, kind: input, shape index: {}]   ;;  %s198_s4 = inlined_call_operand.vmem [shape: f32[1,32], index: 4, kind: input, shape index: {}]   ;;  %s199_s5 = inlined_call_operand.vmem [shape: f32[1,32], index: 5, kind: input, shape index: {}]   ;;  %s200_s6 = inlined_call_operand.vmem [shape: f32[16,32], index: 6, kind: output, shape index: {}]  }
   0x1   :  { %v23_v0 = vld [vmem:[%s194_s0] sm:$0xff]  ;;  %v24_v4 = vld [vmem:[%s194_s0 + $0x8] sm:$0xff]  ;;  %110 = vrcp.f32 %v116_v16 }
   0x2   :  { %v25_v1 = vld [vmem:[%s195_s1] sm:$0xff]  ;;  %v26_v5 = vld [vmem:[%s195_s1 + $0x8] sm:$0xff] }
   0x3   :  { %v29_v2 = vld [vmem:[%s196_s2] sm:$0xff]  ;;  %v27_v3 = vadd.f32 %v25_v1, %v23_v0  ;;  %v28_v7 = vadd.f32 %v26_v5, %v24_v4  ;;  %v30_v8 = vld [vmem:[%s196_s2 + $0x8] sm:$0xff] }
   0x4   :  { %v33_v6 = vld [vmem:[%s197_s3] sm:$0xff]  ;;  %v34_v12 = vld [vmem:[%s197_s3 + $0x8] sm:$0xff] }
   0x5   :  { %v31_v9 = vadd.f32 %v29_v2, %v27_v3  ;;  %v32_v11 = vadd.f32 %v30_v8, %v28_v7  ;;  %v108_v47 = vld [vmem:[%s198_s4] ss:$0 sm:$0xff] }
   0x6   :  { %v109_v50 = vld [vmem:[%s199_s5] ss:$0 sm:$0xff] }
   0x7   :  { %v35_v10 = vadd.f32 %v33_v6, %v31_v9  ;;  %v36_v14 = vadd.f32 %v34_v12, %v32_v11  ;;  %v111_v17 = vpop.eup %110 }
   0x8   :  { %v45_v18 = vmul.f32 32.0, %v111_v17  ;;  %vm49_vm1 = vweird.f32 %v111_v17 }
   0x9   :  { %v38_v13 = vsel %vm37_vm0, %v35_v10, 0.0  ;;  %v41_v15 = vsel %vm37_vm0, %v36_v14, 0.0 }
   0xa   :  { %39 = vadd.xlane.f32.xlu0 %v38_v13  ;;  %v46_v19 = vsub.f32 1.0, %v45_v18 }
   0xc   :  { %v47_v20 = vmul.f32 %v111_v17, %v46_v19 }
   0xe   :  { %v48_v21 = vadd.f32 %v111_v17, %v47_v20 }
  0x10   :  { %v50_v22 = vsel %vm49_vm1, %v111_v17, %v48_v21 }
  0x12   :  { %42 = vadd.xlane.f32.xlu0 %v41_v15 }
  0x7d   :  { %v40_v23 = vpop.xlane.xlu0 %39 }
  0x7e   :  { %v51_v24 = vmul.f32 %v50_v22, %v40_v23 }
  0x80   :  { %v53_v25 = vsub.f32 %v35_v10, %v51_v24 }
  0x82   :  { %v55_v26 = vmul.f32 %v53_v25, %v53_v25 }
  0x84   :  { %v57_v27 = vsel %vm37_vm0, %v55_v26, 0.0 }
  0x85   :  { %58 = vadd.xlane.f32.xlu1 %v57_v27  ;;  %v43_v28 = vpop.xlane.xlu0 %42 }
  0x86   :  { %v52_v29 = vmul.f32 %v50_v22, %v43_v28 }
  0x88   :  { %v54_v30 = vsub.f32 %v36_v14, %v52_v29 }
  0x8a   :  { %v56_v31 = vmul.f32 %v54_v30, %v54_v30 }
  0x8c   :  { %v60_v32 = vsel %vm37_vm0, %v56_v31, 0.0 }
  0x8d   :  { %61 = vadd.xlane.f32.xlu1 %v60_v32 }
  0xf8   :  { %v59_v33 = vpop.xlane.xlu1 %58 }
  0xf9   :  { %v63_v34 = vmul.f32 %v59_v33, %v50_v22 }
  0xfb   :  { %v65_v35 = vadd.f32 1e-05, %v63_v34 }
  0xfd   :  { %112 = vrsqrt.f32 %v65_v35  ;;  %vm73_vm3 = vweird.f32 %v65_v35 }
 0x100   :  { %v62_v36 = vpop.xlane.xlu1 %61 }
 0x101   :  { %v64_v37 = vmul.f32 %v62_v36, %v50_v22 }
 0x103   :  { %v113_v38 = vpop.eup %112  ;;  %v66_v39 = vadd.f32 1e-05, %v64_v37 }
 0x104   :  { %v68_v40 = vmul.f32 %v113_v38, %v65_v35  ;;  %vm74_vm2 = vweird.f32 %v113_v38 }
 0x105   :  { %114 = vrsqrt.f32 %v66_v39  ;;  %vm75_vm4 = vmor %vm73_vm3, %vm74_vm2  ;;  %vm83_vm6 = vweird.f32 %v66_v39 }
 0x106   :  { %v69_v41 = vmul.f32 %v113_v38, %v68_v40 }
 0x108   :  { %v70_v42 = vmul.f32 0.5, %v69_v41 }
 0x10a   :  { %v71_v43 = vsub.f32 1.5, %v70_v42 }
 0x10b   :  { %v115_v44 = vpop.eup %114 }
 0x10c   :  { %v72_v45 = vmul.f32 %v113_v38, %v71_v43  ;;  %v78_v46 = vmul.f32 %v115_v44, %v66_v39  ;;  %vm84_vm5 = vweird.f32 %v115_v44 }
 0x10d   :  { %vm85_vm7 = vmor %vm83_vm6, %vm84_vm5 }
 0x10e   :  { %v76_v48 = vsel %vm75_vm4, %v113_v38, %v72_v45  ;;  %v79_v49 = vmul.f32 %v115_v44, %v78_v46 }
 0x10f   :  { %v87_v51 = vmul.f32 %v76_v48, %v53_v25 }
 0x110   :  { %v80_v52 = vmul.f32 0.5, %v79_v49 }
 0x111   :  { %v93_v53 = vmul.f32 %v108_v47, %v87_v51 }
 0x112   :  { %v81_v54 = vsub.f32 1.5, %v80_v52 }
 0x113   :  { %v99_v55 = vadd.f32 %v109_v50, %v93_v53 }
 0x114   :  { %v82_v56 = vmul.f32 %v115_v44, %v81_v54 }
 0x115   :  { %101 = vst.msk [vmem:[%s200_s6] sm:$0xff] %vm37_vm0, %v99_v55 }
 0x116   :  { %v86_v57 = vsel %vm85_vm7, %v115_v44, %v82_v56 }
 0x117   :  { %v88_v58 = vmul.f32 %v86_v57, %v54_v30 }
 0x119   :  { %v94_v59 = vmul.f32 %v108_v47, %v88_v58 }
 0x11b   :  { %v100_v60 = vadd.f32 %v109_v50, %v94_v59 }
 0x11d   :  { %102 = vst.msk [vmem:[%s200_s6 + $0x8] sm:$0xff] %vm37_vm0, %v100_v60 }

// kernel: transformer_combine_decoder_layer.4
= control target key start
LH: loop header
LB: loop body
LE: loop exit
PB: predicated region body
PF: predicated region fallthrough
CT: control target
= control target key end

     0   :  { %s753_s18 = smov 0   ;;  %s853_s0 = inlined_call_operand.vmem [shape: f32[2,8,32], index: 0, kind: input, shape index: {}]   ;;  %s854_s1 = inlined_call_operand.vmem [shape: bf16[32,96], index: 1, kind: input, shape index: {}]   ;;  %s855_s2 = inlined_call_operand.vmem [shape: f32[1,96], index: 2, kind: input, shape index: {}]   ;;  %s856_s3 = inlined_call_operand.vmem [shape: f32[32,32], index: 3, kind: input, shape index: {}]   ;;  %s857_s4 = inlined_call_operand.vmem [shape: f32[1,32], index: 4, kind: input, shape index: {}]   ;;  %s858_s5 = inlined_call_operand.vmem [shape: f32[2,8,32], index: 5, kind: output, shape index: {}]  }
   0x1 LB: > { %s635_s19 = sadd.s32 4294967295, %s710_s18   ;;  %p639_p0 = scmp.ge.s32.totalorder %s710_s18, 1  ;;  %s710_s18 = sphi %s753_s18, %s15_s18  }
   0x2   : > { %p186_p1 = scmp.lt.s32.totalorder %s710_s18, 3 }
   0x4   : > { %p187_p2 = pnand %p639_p0, %p186_p1 }
   0x5   : > { %p212_p3 = scmp.lt.s32.totalorder (!%p187_p2), %s635_s19, 1  ;;  %s712_s30 = smov (!%p187_p2), 88  }
   0x6   : > { %190 = sbr.rel (%p187_p2) target bundleno = 1477 (0x5c5), region = 40  ;;  %s713_s6 = smov (!%p187_p2), 96  }
   0x7   : > { %s714_s7 = smov (!%p187_p2), 120   ;;  %s715_s8 = smov (!%p187_p2), 80  }
   0x8   : > { %s716_s9 = smov (!%p187_p2), 72   ;;  %s717_s10 = smov (!%p187_p2), 112  }
   0x9   : > { %s718_s13 = smov (!%p187_p2), 56   ;;  %s719_s14 = smov (!%p187_p2), 40  }
   0xa   : > { %s720_s15 = smov (!%p187_p2), 64   ;;  %s721_s16 = smov (!%p187_p2), 104  }
   0xb   : > { %v666_v0 = vld [vmem:[%s854_s1 + $0x8] sm:$0xff]  ;;  %v665_v1 = vld [vmem:[%s854_s1] sm:$0xff]  ;;  %s860_s19 = smov (!%p212_p3, %s635_s19), 1  ;;  %vm243_vm0 = vcmask 261120   ;;  %vm268_vm1 = vcmask 64512   ;;  %vm305_vm2 = vcmask 1043456  }
   0xc   : > { %253 = vmatpush.bf16.msra.mxu0 %v666_v0  ;;  %s640_s24 = sshll.u32 %s860_s19, 3  ;;  %v686_v4 = vld [vmem:[%s855_s2] ss:$0 sm:$0xff]  ;;  %v261_v56 = vld [vmem:[%s856_s3 + $0x8] sm:$0xff]  ;;  %s722_s21 = smov 48  }
   0xd   : > { %s215_s27 = scalar_lea.vmem %s853_s0, %s640_s24  ;;  %v260_v14 = vld [vmem:[%s856_s3] sm:$0xff]  ;;  %v380_v57 = vpack.c.bf16 %v261_v56, %v261_v56 }
   0xe   : > { %v221_v2 = vld [vmem:[%s215_s27] sm:$0xff]  ;;  %v322_v15 = vpack.c.bf16 %v260_v14, %v260_v14 }
   0xf   : > { %v222_v3 = vpack.c.bf16 %v221_v2, %v221_v2  ;;  %v386_v58 = vsel %vm305_vm2, %v380_v57, 0 }
  0x10   : > { %254 = vmatpush.bf16.msra.mxu0 %v665_v1  ;;  %v405_v18 = vsel %vm305_vm2, %v322_v15, 0 }
  0x13   : > { %650 = vmatmul.msk.bf16.vlgmr.msra.gmra.mxu0 %vm243_vm0, %v222_v3 }
  0x14   : > { %395 = vmatpush.bf16.msrb.mxu0 %v386_v58 }
  0x90   : > { %v256_v5 = vpop.f32.mrf.mxu0 }
  0x91   : > { %v257_v6 = vadd.f32 %v686_v4, %v256_v5 }
  0x93   : > { %v779_v7 = vpack.c.bf16 %v257_v6, %v257_v6 }
  0x95   : > { %326 = vrot.lane.b32.xlu2 %v779_v7, %s712_s30  ;;  %266 = vrot.lane.b32.xlu0 %v779_v7, %s713_s6  ;;  %s219_s6 = scalar_lea.vmem %s858_s5, %s640_s24 }
  0x98   : > { %v258_v8 = vpop.f32.mrf.mxu0 }
  0x9d   : > { %324 = vrot.lane.b32.xlu2 %v779_v7, %s714_s7 }
  0xa5   : > { %422 = vrot.lane.b32.xlu2 %v779_v7, %s715_s8 }
  0xad   : > { %500 = vrot.lane.b32.xlu2 %v779_v7, %s716_s9 }
  0xb5   : > { %420 = vrot.lane.b32.xlu2 %v779_v7, %s717_s10 }
  0xef   : > { %v327_v9 = vpop.permute.xlu2 %326 }
  0xf0   : > { %v332_v10 = vsel %vm268_vm1, %v327_v9, 0 }
  0xf1   : > { %341 = vmatpush.bf16.xpose.msra.mxu3 %v332_v10 }
  0xf7   : > { %v325_v11 = vpop.permute.xlu2 %324 }
  0xf8   : > { %653 = vmatmul.msk.bf16.vlgmr.msra.gmra.mxu3 %vm268_vm1, %v325_v11 }
  0xff   : > { %v423_v12 = vpop.permute.xlu2 %422 }
 0x100   : > { %v428_v13 = vsel %vm268_vm1, %v423_v12, 0 }
 0x101   : > { %437 = vmatpush.bf16.xpose.msrb.mxu3 %v428_v13 }
 0x107   : > { %v501_v16 = vpop.permute.xlu2 %500  ;;  %v267_v17 = vpop.permute.xlu0 %266 }
 0x108   : > { %v273_v19 = vsel %vm268_vm1, %v267_v17, 0  ;;  %v506_v21 = vsel %vm268_vm1, %v501_v16, 0 }
 0x109   : > { %282 = vmatpush.bf16.xpose.msra.mxu1 %v273_v19 }
 0x10f   : > { %v421_v20 = vpop.permute.xlu2 %420 }
 0x110   : > { %651 = vmatmul.msk.bf16.vlgmr.msra.gmra.mxu1 %vm268_vm1, %v779_v7  ;;  %657 = vmatmul.msk.bf16.vlgmr.msrb.gmra.mxu3 %vm268_vm1, %v421_v20 }
 0x111   : > { %414 = vmatpush.bf16.msrb.mxu1 %v405_v18 }
 0x115   : > { %515 = vmatpush.bf16.xpose.msra.mxu1 %v506_v21 }
 0x17b   : > { %v343_v22 = vpop.f32.mrf.mxu3 }
 0x17c   : > { %v347_v23 = vsel %vm268_vm1, %v343_v22, -inf }
 0x17d   : > { %348 = vmax.xlane.f32.xlu2 %v347_v23 }
 0x183   : > { %v345_v24 = vpop.f32.mrf.mxu3 }
 0x18d   : > { %v284_v25 = vpop.f32.mrf.mxu1 }
 0x18e   : > { %v288_v26 = vsel %vm268_vm1, %v284_v25, -inf }
 0x18f   : > { %289 = vmax.xlane.f32.xlu0 %v288_v26 }
 0x193   : > { %v801_v27 = vpop.f32.mrf.mxu3 }
 0x194   : > { %v443_v29 = vsel %vm268_vm1, %v801_v27, -inf }
 0x195   : > { %v286_v28 = vpop.f32.mrf.mxu1 }
 0x197   : > { %444 = vmax.xlane.f32.xlu0 %v443_v29 }
 0x19b   : > { %v441_v30 = vpop.f32.mrf.mxu3 }
 0x1f0   : > { %v349_v31 = vpop.xlane.xlu2 %348 }
 0x1f1   : > { %v350_v32 = vsub.f32 %v343_v22, %v349_v31  ;;  %v263_v22 = vld [vmem:[%s856_s3 + $0x18] sm:$0xff] }
 0x1f2   : > { %v554_v24 = vpack.c.bf16 %v263_v22, %v263_v22 }
 0x1f3   : > { %v351_v33 = vmul.f32 1.442695, %v350_v32  ;;  %v262_v32 = vld [vmem:[%s856_s3 + $0x10] sm:$0xff] }
 0x1f4   : > { %v560_v29 = vsel %vm305_vm2, %v554_v24, 0 }
 0x1f5   : > { %688 = vpow2.f32 %v351_v33  ;;  %v476_v33 = vpack.c.bf16 %v262_v32, %v262_v32 }
 0x1fb   : > { %v689_v34 = vpop.eup %688 }
 0x1fc   : > { %v353_v35 = vsel %vm268_vm1, %v689_v34, 0.0 }
 0x1fd   : > { %354 = vadd.xlane.f32.xlu0 %v353_v35 }
 0x202   : > { %v290_v36 = vpop.xlane.xlu0 %289 }
 0x203   : > { %v291_v37 = vsub.f32 %v284_v25, %v290_v36 }
 0x205   : > { %v292_v38 = vmul.f32 1.442695, %v291_v37 }
 0x207   : > { %690 = vpow2.f32 %v292_v38 }
 0x20a   : > { %v445_v41 = vpop.xlane.xlu0 %444 }
 0x20b   : > { %v446_v3 = vsub.f32 %v801_v27, %v445_v41 }
 0x20d   : > { %v691_v39 = vpop.eup %690  ;;  %v447_v5 = vmul.f32 1.442695, %v446_v3 }
 0x20e   : > { %v294_v40 = vsel %vm268_vm1, %v691_v39, 0.0 }
 0x20f   : > { %295 = vadd.xlane.f32.xlu1 %v294_v40 }
 0x211   : > { %359 = vrot.lane.b32.xlu0 %v779_v7, %s718_s13 }
 0x219   : > { %533 = vrot.lane.b32.xlu0 %v779_v7, %s719_s14 }
 0x228   : > { %300 = vrot.lane.b32.xlu1 %v779_v7, %s720_s15 }
 0x230   : > { %498 = vrot.lane.b32.xlu1 %v779_v7, %s721_s16 }
 0x270   : > { %v355_v42 = vpop.xlane.xlu0 %354 }
 0x282   : > { %v296_v46 = vpop.xlane.xlu1 %295 }
 0x283   : > { %v360_v43 = vpop.permute.xlu0 %359  ;;  %692 = vrcp.f32 %v296_v46 }
 0x284   : > { %v365_v51 = vsel %vm305_vm2, %v360_v43, 0  ;;  %694 = vrcp.f32 %v355_v42  ;;  %v687_v43 = vld [vmem:[%s857_s4] ss:$0 sm:$0xff] }
 0x285   : > { %696 = vpow2.f32 %v447_v5 }
 0x289   : > { %v693_v47 = vpop.eup %692 }
 0x28a   : > { %v298_v48 = vmul.f32 %v693_v47, %v691_v39  ;;  %v695_v53 = vpop.eup %694 }
 0x28b   : > { %v534_v44 = vpop.permute.xlu0 %533  ;;  %v357_v54 = vmul.f32 %v695_v53, %v689_v34  ;;  %v697_v11 = vpop.eup %696  ;;  %v482_v34 = vsel %vm305_vm2, %v476_v33, 0 }
 0x28c   : > { %v539_v45 = vsel %vm305_vm2, %v534_v44, 0  ;;  %v299_v52 = vpack.c.bf16 %v298_v48, %v298_v48  ;;  %v449_v14 = vsel %vm268_vm1, %v697_v11, 0.0  ;;  %491 = vmatpush.bf16.msra.mxu0 %v482_v34 }
 0x28d   : > { %548 = vmatpush.bf16.msra.mxu3 %v539_v45  ;;  %v358_v55 = vpack.c.bf16 %v357_v54, %v357_v54 }
 0x29a   : > { %v301_v49 = vpop.permute.xlu1 %300 }
 0x29b   : > { %v307_v50 = vsel %vm305_vm2, %v301_v49, 0 }
 0x29c   : > { %316 = vmatpush.bf16.msra.mxu2 %v307_v50 }
 0x29f   : > { %652 = vmatmul.msk.bf16.vlgmr.msra.gmra.mxu2 %vm268_vm1, %v299_v52 }
 0x2a0   : > { %374 = vmatpush.bf16.msrb.mxu2 %v365_v51 }
 0x2a2   : > { %v499_v0 = vpop.permute.xlu1 %498 }
 0x2af   : > { %654 = vmatmul.msk.bf16.vlgmr.msrb.gmra.mxu2 %vm268_vm1, %v358_v55 }
 0x322   : > { %v318_v59 = vpop.f32.mrf.mxu2 }
 0x323   : > { %v323_v60 = vpack.c.bf16 %v318_v59, %v318_v59 }
 0x325   : > { %656 = vmatmul.msk.bf16.vlgmr.msrb.gmra.mxu1 %vm268_vm1, %v323_v60 }
 0x32a   : > { %v320_v61 = vpop.f32.mrf.mxu2 }
 0x332   : > { %v376_v62 = vpop.f32.mrf.mxu2 }
 0x333   : > { %v381_v63 = vpack.c.bf16 %v376_v62, %v376_v62 }
 0x335   : > { %655 = vmatmul.msk.bf16.vlgmr.msrb.gmra.mxu0 %vm268_vm1, %v381_v63  ;;  %660 = vmatmul.msk.bf16.vlgmr.msra.gmra.mxu1 %vm268_vm1, %v499_v0 }
 0x33a   : > { %v378_v1 = vpop.f32.mrf.mxu2 }
 0x3a2   : > { %v416_v2 = vpop.f32.mrf.mxu1 }
 0x3aa   : > { %v418_v4 = vpop.f32.mrf.mxu1 }
 0x3b2   : > { %v397_v6 = vpop.f32.mrf.mxu0  ;;  %v517_v8 = vpop.f32.mrf.mxu1 }
 0x3b3   : > { %v417_v9 = vadd.f32 %v416_v2, %v397_v6  ;;  %v521_v10 = vsel %vm268_vm1, %v517_v8, -inf }
 0x3b4   : > { %522 = vmax.xlane.f32.xlu1 %v521_v10 }
 0x3ba   : > { %v399_v12 = vpop.f32.mrf.mxu0  ;;  %v519_v13 = vpop.f32.mrf.mxu1 }
 0x3bc   : > { %450 = vadd.xlane.f32.xlu1 %v449_v14 }
 0x427   : > { %v523_v15 = vpop.xlane.xlu1 %522 }
 0x428   : > { %v524_v16 = vsub.f32 %v517_v8, %v523_v15 }
 0x42a   : > { %v525_v17 = vmul.f32 1.442695, %v524_v16 }
 0x42c   : > { %698 = vpow2.f32 %v525_v17 }
 0x42f   : > { %v451_v20 = vpop.xlane.xlu1 %450 }
 0x430   : > { %700 = vrcp.f32 %v451_v20 }
 0x432   : > { %v699_v18 = vpop.eup %698 }
 0x433   : > { %v527_v19 = vsel %vm268_vm1, %v699_v18, 0.0 }
 0x434   : > { %528 = vadd.xlane.f32.xlu2 %v527_v19 }
 0x436   : > { %v701_v23 = vpop.eup %700 }
 0x437   : > { %v453_v26 = vmul.f32 %v701_v23, %v697_v11 }
 0x44c   : > { %455 = vrot.lane.b32.xlu2 %v779_v7, %s722_s21  ;;  %v454_v7 = vpack.c.bf16 %v453_v26, %v453_v26 }
 0x4a7   : > { %v529_v21 = vpop.xlane.xlu2 %528 }
 0x4a8   : > { %702 = vrcp.f32 %v529_v21 }
 0x4ae   : > { %v703_v25 = vpop.eup %702 }
 0x4af   : > { %v531_v27 = vmul.f32 %v703_v25, %v699_v18  ;;  %v456_v28 = vpop.permute.xlu2 %455 }
 0x4b0   : > { %v461_v30 = vsel %vm305_vm2, %v456_v28, 0 }
 0x4b1   : > { %v532_v31 = vpack.c.bf16 %v531_v27, %v531_v27  ;;  %470 = vmatpush.bf16.msra.mxu2 %v461_v30 }
 0x4b3   : > { %661 = vmatmul.msk.bf16.vlgmr.msra.gmra.mxu3 %vm268_vm1, %v532_v31 }
 0x4b4   : > { %658 = vmatmul.msk.bf16.vlgmr.msra.gmra.mxu2 %vm268_vm1, %v454_v7 }
 0x4b5   : > { %569 = vmatpush.bf16.msrb.mxu2 %v560_v29 }
 0x536   : > { %v550_v35 = vpop.f32.mrf.mxu3 }
 0x537   : > { %v555_v36 = vpack.c.bf16 %v550_v35, %v550_v35  ;;  %v472_v37 = vpop.f32.mrf.mxu2 }
 0x538   : > { %v477_v38 = vpack.c.bf16 %v472_v37, %v472_v37 }
 0x539   : > { %662 = vmatmul.msk.bf16.vlgmr.msrb.gmra.mxu2 %vm268_vm1, %v555_v36 }
 0x53a   : > { %659 = vmatmul.msk.bf16.vlgmr.msra.gmra.mxu0 %vm268_vm1, %v477_v38 }
 0x53e   : > { %v552_v39 = vpop.f32.mrf.mxu3 }
 0x53f   : > { %v474_v40 = vpop.f32.mrf.mxu2 }
 0x5b7   : > { %v493_v41 = vpop.f32.mrf.mxu0 }
 0x5b8   : > { %v497_v42 = vadd.f32 %v493_v41, %v417_v9 }
 0x5bc   : > { %v571_v44 = vpop.f32.mrf.mxu2 }
 0x5bd   : > { %v575_v45 = vadd.f32 %v571_v44, %v497_v42 }
 0x5bf   : > { %v580_v46 = vadd.f32 %v687_v43, %v575_v45  ;;  %v495_v47 = vpop.f32.mrf.mxu0 }
 0x5c1   : > { %581 = vst.msk [vmem:[%s219_s6] sm:$0xff] %vm243_vm0, %v580_v46 }
 0x5c4   : > { %v573_v48 = vpop.f32.mrf.mxu2 }
 0x5c5 PF: > { %s15_s18 = sadd.s32 1, %s710_s18  }
 0x5c6   : > { %p12_p4 = scmp.ge.s32.totalorder %s15_s18, 4  }
 0x5c8   :  { %14 = sbr.rel (!%p12_p4) target bundleno = 1 (0x1), region = 70 }

// kernel: transformer_combine_decoder_layer.5
= control target key start
LH: loop header
LB: loop body
LE: loop exit
PB: predicated region body
PF: predicated region fallthrough
CT: control target
= control target key end

     0   :  { %s1298_s0 = inlined_call_operand.vmem [shape: f32[2,8,32], index: 0, kind: input, shape index: {}]   ;;  %s1299_s1 = inlined_call_operand.vmem [shape: f32[2,16,32], index: 1, kind: input, shape index: {}]   ;;  %s1300_s2 = inlined_call_operand.vmem [shape: bf16[32,32], index: 2, kind: input, shape index: {}]   ;;  %s1301_s3 = inlined_call_operand.vmem [shape: f32[1,32], index: 3, kind: input, shape index: {}]   ;;  %s1302_s4 = inlined_call_operand.vmem [shape: bf16[32,64], index: 4, kind: input, shape index: {}]   ;;  %s1303_s5 = inlined_call_operand.vmem [shape: f32[1,64], index: 5, kind: input, shape index: {}]   ;;  %s1304_s6 = inlined_call_operand.vmem [shape: f32[32,32], index: 6, kind: input, shape index: {}]   ;;  %s1305_s7 = inlined_call_operand.vmem [shape: f32[1,32], index: 7, kind: input, shape index: {}]   ;;  %s1306_s8 = inlined_call_operand.vmem [shape: f32[2,8,32], index: 8, kind: output, shape index: {0}]   ;;  %s1307_s9 = inlined_call_operand.hbm [shape: f32[2,8,16], index: 9, kind: output, shape index: {1}]  }
   0x1   :  { %1309 = sst [smem:[#allocation5_spill]] %s1298_s0 }
   0x2   :  { %1310 = sst [smem:[#allocation6_spill]] %s1299_s1 }
   0x3   :  { %15 = vsyncpa [#allocation3], 0 }
   0x4   :  { %17 = vsyncpa [#allocation3 + $0x1], 0  ;;  %s1112_s30 = smov 0   ;;  %s1114_s10 = smov 0  }
   0x5   :  { %s1116_s11 = smov 0   ;;  %s1118_s12 = smov 0  }
   0x6 LB: > { %s1133_s13 = sadd.s32 4294967295, %s1053_s12   ;;  %s878_s14 = sadd.s32 4294967294, %s1053_s12   ;;  %s1053_s12 = sphi %s1118_s12, %s1319_s12   ;;  %s1049_s11 = sphi %s1116_s11, %s1318_s11   ;;  %s1045_s10 = sphi %s1114_s10, %s1317_s10   ;;  %s1041_s30 = sphi %s1112_s30, %s1316_s30  }
   0x7   : > { %s1137_s15 = sadd.s32 1, %s1053_s12   ;;  %s234_s16 = sadd.s32 1, %s1049_s11 }
   0x8   : > { %s231_s17 = ssub.s32 %s1053_s12, %s1137_s15  ;;  %p244_p0 = scmp.ne.s32.totalorder %s1049_s11, %s1045_s10 }
   0x9   : > { %p232_p1 = scmp.eq.s32.totalorder %s231_s17, 0  ;;  %p245_p2 = scmp.eq.s32.totalorder %s1133_s13, 1 }
   0xa   : > { %p250_p3 = scmp.ne.s32.totalorder %s1045_s10, %s1041_s30  ;;  %p251_p4 = scmp.eq.s32.totalorder %s878_s14, 1 }
   0xb   : > { %s1148_s18 = scalar_select %p232_p1, %s1049_s11, %s234_s16  }
   0xc   : > { %p1150_p5 = por %p245_p2, %p244_p0  ;;  %p1154_p6 = por %p251_p4, %p250_p3 }
   0xd   : > { %p881_p7 = scmp.ge.s32.totalorder %s1053_s12, 1  ;;  %p302_p8 = scmp.lt.s32.totalorder %s1053_s12, 3 }
   0xf   : > { %p303_p9 = pnand %p881_p7, %p302_p8 }
  0x10   : > { %p346_p10 = scmp.lt.s32.totalorder (!%p303_p9), %s1133_s13, 1  ;;  %s1313_s0 = sld [smem:[#allocation5_spill]] (!%p303_p9) }
  0x11   : > { %306 = sbr.rel (%p303_p9) target bundleno = 1372 (0x55c), region = 52  ;;  %s1314_s1 = sld [smem:[#allocation6_spill]] (!%p303_p9) }
  0x12   : > { %s1055_s28 = smov (!%p303_p9), 120   ;;  %s1056_s21 = smov (!%p303_p9), 96  }
  0x13   : > { %s1058_s23 = smov (!%p303_p9), 112   ;;  %s1059_s26 = smov (!%p303_p9), 88  }
  0x14   : > { %s1060_s27 = smov (!%p303_p9), 80  }
  0x16   : > { %v923_v0 = vld [vmem:[%s1300_s2 + $0x8] sm:$0xff]  ;;  %v922_v2 = vld [vmem:[%s1300_s2] sm:$0xff]  ;;  %s1174_s29 = scalar_select %p346_p10, %s1133_s13, 1  ;;  %vm385_vm0 = vcmask 261120   ;;  %vm445_vm1 = vcmask 64512   ;;  %vm562_vm2 = vcmask 1043456  }
  0x17   : > { %v925_v1 = vld [vmem:[%s1302_s4 + $0x8] sm:$0xff]  ;;  %395 = vmatpush.bf16.msra.mxu0 %v923_v0  ;;  %v924_v3 = vld [vmem:[%s1302_s4] sm:$0xff]  ;;  %vm465_vm3 = vcmask 130048  }
  0x18   : > { %431 = vmatpush.bf16.msra.mxu1 %v925_v1  ;;  %s1308_s14 = sshll.u32 %s1174_s29, 3  ;;  %s921_s16 = sshll.u32 %s1174_s29, 4  ;;  %v972_v9 = vld [vmem:[%s1301_s3] ss:$0 sm:$0xff] }
  0x19   : > { %s349_s22 = scalar_lea.vmem %s1313_s0, %s1308_s14  ;;  %s354_s25 = scalar_lea.vmem %s1314_s1, %s921_s16  ;;  %v973_v14 = vld [vmem:[%s1303_s5] ss:$0 sm:$0xff] }
  0x1a   : > { %v360_v4 = vld [vmem:[%s349_s22] sm:$0xff]  ;;  %v363_v7 = vld [vmem:[%s354_s25 + $0x8] sm:$0xff]  ;;  %s1057_s22 = smov 104   ;;  %s1011_s1 = scalar_lea.hbm %s1307_s9, 16 }
  0x1b   : > { %396 = vmatpush.bf16.msra.mxu0 %v922_v2  ;;  %v361_v5 = vpack.c.bf16 %v360_v4, %v360_v4  ;;  %v362_v6 = vld [vmem:[%s354_s25] sm:$0xff] }
  0x1c   : > { %432 = vmatpush.bf16.msra.mxu1 %v924_v3  ;;  %v364_v8 = vpack.c.bf16 %v363_v7, %v362_v6  ;;  %v439_v21 = vld [vmem:[%s1304_s6] sm:$0xff] }
  0x1d   : > { %v499_v22 = vpack.c.bf16 %v439_v21, %v439_v21 }
  0x1e   : > { %895 = vmatmul.msk.bf16.vlgmr.msra.gmra.mxu0 %vm385_vm0, %v361_v5 }
  0x1f   : > { %904 = vmatmul.msk.bf16.vlgmr.msra.gmra.mxu1 %vm385_vm0, %v364_v8  ;;  %v583_v23 = vsel %vm562_vm2, %v499_v22, 0 }
  0x9b   : > { %v398_v10 = vpop.f32.mrf.mxu0 }
  0x9c   : > { %v399_v11 = vadd.f32 %v972_v9, %v398_v10  ;;  %v434_v12 = vpop.f32.mrf.mxu1 }
  0x9d   : > { %v435_v17 = vadd.f32 %v973_v14, %v434_v12 }
  0x9e   : > { %v443_v13 = vpack.c.bf16 %v399_v11, %v399_v11 }
  0xa0   : > { %502 = vrot.lane.b32.xlu2 %v443_v13, %s1055_s28 }
  0xa3   : > { %v400_v15 = vpop.f32.mrf.mxu0 }
  0xa4   : > { %v436_v16 = vpop.f32.mrf.mxu1 }
  0xa5   : > { %v437_v18 = vadd.f32 %v973_v14, %v436_v16 }
  0xa7   : > { %v1194_v19 = vpack.c.bf16 %v437_v18, %v435_v17 }
  0xa9   : > { %480 = vrot.lane.b32.xlu1 %v1194_v19, %s1056_s21  ;;  %677 = vrot.lane.b32.xlu2 %v1194_v19, %s1057_s22  ;;  %v450_v20 = vsel %vm445_vm1, %v1194_v19, 0 }
  0xaa   : > { %459 = vmatpush.bf16.xpose.msra.mxu2 %v450_v20 }
  0xb1   : > { %504 = vrot.lane.b32.xlu1 %v1194_v19, %s1055_s28  ;;  %598 = vrot.lane.b32.xlu2 %v443_v13, %s1058_s23  ;;  %s1061_s28 = smov 72  }
  0xb2   : > { %905 = vmatmul.msk.bf16.vlgmr.msra.gmra.mxu2 %vm445_vm1, %v443_v13 }
  0xb3   : > { %592 = vmatpush.bf16.msrb.mxu2 %v583_v23 }
  0xb9   : > { %675 = vrot.lane.b32.xlu1 %v443_v13, %s1057_s22 }
  0xfa   : > { %v503_v24 = vpop.permute.xlu2 %502 }
 0x103   : > { %v678_v25 = vpop.permute.xlu2 %677 }
 0x104   : > { %v683_v26 = vsel %vm445_vm1, %v678_v25, 0 }
 0x105   : > { %692 = vmatpush.bf16.xpose.msra.mxu2 %v683_v26 }
 0x10b   : > { %v599_v44 = vpop.permute.xlu2 %598 }
 0x11b   : > { %v481_v27 = vpop.permute.xlu1 %480 }
 0x11c   : > { %493 = vmatpush.bf16.msra.mxu3 %v481_v27  ;;  %v441_v27 = vld [vmem:[%s1304_s6 + $0x10] sm:$0xff] }
 0x123   : > { %v505_v28 = vpop.permute.xlu1 %504 }
 0x124   : > { %v510_v29 = vsel %vm445_vm1, %v505_v28, 0  ;;  %v653_v28 = vpack.c.bf16 %v441_v27, %v441_v27 }
 0x125   : > { %519 = vmatpush.bf16.xpose.msrb.mxu3 %v510_v29 }
 0x12b   : > { %v676_v50 = vpop.permute.xlu1 %675 }
 0x135   : > { %v461_v30 = vpop.f32.mrf.mxu2 }
 0x136   : > { %v466_v31 = vsel %vm465_vm3, %v461_v30, -inf }
 0x137   : > { %467 = vmax.xlane.f32.xlu0 %v466_v31 }
 0x13d   : > { %v463_v32 = vpop.f32.mrf.mxu2 }
 0x1aa   : > { %v468_v33 = vpop.xlane.xlu0 %467 }
 0x1ab   : > { %v469_v34 = vsub.f32 %v461_v30, %v468_v33  ;;  %v659_v30 = vsel %vm562_vm2, %v653_v28, 0 }
 0x1ad   : > { %v470_v35 = vmul.f32 1.442695, %v469_v34 }
 0x1af   : > { %975 = vpow2.f32 %v470_v35 }
 0x1b5   : > { %v976_v36 = vpop.eup %975 }
 0x1b6   : > { %v472_v37 = vsel %vm465_vm3, %v976_v36, 0.0 }
 0x1b7   : > { %473 = vadd.xlane.f32.xlu0 %v472_v37 }
 0x1cb   : > { %600 = vrot.lane.b32.xlu0 %v1194_v19, %s1058_s23  ;;  %s343_s23 = sand.u32 1, %s1045_s10  }
 0x1cc   : > { %s882_s24 = sshll.u32 %s343_s23, 3 }
 0x1cd   : > { %s345_s25 = scalar_lea.vmem [#allocation2], %s882_s24 }
 0x1ce   : > { %s780_s22 = sshll.u32 %s345_s25, 4  ;;  %s781_s22 = int_to_ptr.vmem [resolvable:$true] %s780_s22 }
 0x22a   : > { %v474_v38 = vpop.xlane.xlu0 %473 }
 0x22b   : > { %977 = vrcp.f32 %v474_v38 }
 0x231   : > { %v978_v39 = vpop.eup %977 }
 0x232   : > { %v1211_v40 = vmul.f32 %v978_v39, %v976_v36 }
 0x234   : > { %v478_v41 = vpack.c.bf16 %v1211_v40, %v1211_v40 }
 0x236   : > { %906 = vmatmul.msk.bf16.vlgmr.msra.gmra.mxu3 %vm465_vm3, %v478_v41 }
 0x23d   : > { %v601_v42 = vpop.permute.xlu0 %600 }
 0x23e   : > { %v606_v43 = vsel %vm445_vm1, %v601_v42, 0  ;;  %v442_v42 = vld [vmem:[%s1304_s6 + $0x18] sm:$0xff] }
 0x23f   : > { %615 = vmatpush.bf16.xpose.msra.mxu3 %v606_v43  ;;  %v730_v43 = vpack.c.bf16 %v442_v42, %v442_v42 }
 0x246   : > { %907 = vmatmul.msk.bf16.vlgmr.msrb.gmra.mxu3 %vm445_vm1, %v503_v24  ;;  %v440_v24 = vld [vmem:[%s1304_s6 + $0x8] sm:$0xff] }
 0x247   : > { %v557_v25 = vpack.c.bf16 %v440_v24, %v440_v24 }
 0x249   : > { %v564_v26 = vsel %vm562_vm2, %v557_v25, 0 }
 0x24a   : > { %573 = vmatpush.bf16.msrb.mxu1 %v564_v26 }
 0x24e   : > { %668 = vmatpush.bf16.msra.mxu1 %v659_v30 }
 0x256   : > { %911 = vmatmul.msk.bf16.vlgmr.msra.gmra.mxu3 %vm445_vm1, %v599_v44  ;;  %v736_v44 = vsel %vm562_vm2, %v730_v43, 0 }
 0x2b9   : > { %v495_v45 = vpop.f32.mrf.mxu3 }
 0x2ba   : > { %v500_v46 = vpack.c.bf16 %v495_v45, %v495_v45 }
 0x2bc   : > { %910 = vmatmul.msk.bf16.vlgmr.msrb.gmra.mxu2 %vm445_vm1, %v500_v46 }
 0x2c1   : > { %v497_v47 = vpop.f32.mrf.mxu3 }
 0x2c9   : > { %v521_v48 = vpop.f32.mrf.mxu3 }
 0x2ca   : > { %v525_v49 = vsel %vm465_vm3, %v521_v48, -inf }
 0x2cb   : > { %526 = vmax.xlane.f32.xlu1 %v525_v49 }
 0x2cc   : > { %914 = vmatmul.msk.bf16.vlgmr.msra.gmra.mxu2 %vm445_vm1, %v676_v50 }
 0x2d1   : > { %v523_v51 = vpop.f32.mrf.mxu3 }
 0x2d9   : > { %v617_v52 = vpop.f32.mrf.mxu3 }
 0x2da   : > { %v621_v53 = vsel %vm465_vm3, %v617_v52, -inf }
 0x2db   : > { %622 = vmax.xlane.f32.xlu0 %v621_v53 }
 0x2e1   : > { %v619_v54 = vpop.f32.mrf.mxu3 }
 0x2e4   : > { %538 = vrot.lane.b32.xlu1 %v1194_v19, %s1059_s26  ;;  %s765_s26 = scalar_lea.sflag [#allocation3], %s343_s23 }
 0x33e   : > { %v527_v56 = vpop.xlane.xlu1 %526 }
 0x33f   : > { %v1224_v55 = vpop.f32.mrf.mxu2  ;;  %v528_v57 = vsub.f32 %v521_v48, %v527_v56 }
 0x341   : > { %v529_v59 = vmul.f32 1.442695, %v528_v57 }
 0x343   : > { %979 = vpow2.f32 %v529_v59 }
 0x347   : > { %v596_v58 = vpop.f32.mrf.mxu2 }
 0x349   : > { %v980_v1 = vpop.eup %979 }
 0x34a   : > { %v531_v4 = vsel %vm465_vm3, %v980_v1, 0.0 }
 0x34e   : > { %v623_v60 = vpop.xlane.xlu0 %622 }
 0x34f   : > { %v624_v61 = vsub.f32 %v617_v52, %v623_v60  ;;  %v694_v62 = vpop.f32.mrf.mxu2 }
 0x350   : > { %v698_v63 = vsel %vm465_vm3, %v694_v62, -inf }
 0x351   : > { %v625_v0 = vmul.f32 1.442695, %v624_v61  ;;  %699 = vmax.xlane.f32.xlu2 %v698_v63 }
 0x353   : > { %981 = vpow2.f32 %v625_v0 }
 0x356   : > { %v539_v2 = vpop.permute.xlu1 %538 }
 0x357   : > { %551 = vmatpush.bf16.msrb.mxu0 %v539_v2  ;;  %v696_v3 = vpop.f32.mrf.mxu2 }
 0x359   : > { %v982_v5 = vpop.eup %981  ;;  %532 = vadd.xlane.f32.xlu2 %v531_v4 }
 0x35a   : > { %v627_v6 = vsel %vm465_vm3, %v982_v5, 0.0 }
 0x35b   : > { %628 = vadd.xlane.f32.xlu0 %v627_v6 }
 0x36f   : > { %634 = vrot.lane.b32.xlu0 %v1194_v19, %s1060_s27 }
 0x3c4   : > { %v700_v7 = vpop.xlane.xlu2 %699 }
 0x3c5   : > { %v701_v8 = vsub.f32 %v694_v62, %v700_v7 }
 0x3c7   : > { %v702_v9 = vmul.f32 1.442695, %v701_v8 }
 0x3c9   : > { %983 = vpow2.f32 %v702_v9 }
 0x3cc   : > { %v533_v10 = vpop.xlane.xlu2 %532 }
 0x3cd   : > { %985 = vrcp.f32 %v533_v10 }
 0x3ce   : > { %v629_v11 = vpop.xlane.xlu0 %628 }
 0x3cf   : > { %v984_v12 = vpop.eup %983  ;;  %987 = vrcp.f32 %v629_v11 }
 0x3d0   : > { %v704_v13 = vsel %vm465_vm3, %v984_v12, 0.0 }
 0x3d1   : > { %705 = vadd.xlane.f32.xlu2 %v704_v13 }
 0x3d3   : > { %v986_v14 = vpop.eup %985 }
 0x3d4   : > { %v535_v15 = vmul.f32 %v986_v14, %v980_v1 }
 0x3d5   : > { %v988_v16 = vpop.eup %987 }
 0x3d6   : > { %v536_v17 = vadd.f32 %v535_v15, %v1211_v40  ;;  %v631_v18 = vmul.f32 %v988_v16, %v982_v5  ;;  %v537_v20 = vpack.c.bf16 %v535_v15, %v535_v15 }
 0x3d8   : > { %v632_v21 = vadd.f32 %v631_v18, %v536_v17  ;;  %908 = vmatmul.msk.bf16.vlgmr.msrb.gmra.mxu0 %vm465_vm3, %v537_v20  ;;  %v633_v23 = vpack.c.bf16 %v631_v18, %v631_v18 }
 0x3e1   : > { %v635_v22 = vpop.permute.xlu0 %634 }
 0x3e2   : > { %647 = vmatpush.bf16.msra.mxu0 %v635_v22 }
 0x3e6   : > { %745 = vmatpush.bf16.msrb.mxu0 %v736_v44 }
 0x3e8   : > { %912 = vmatmul.msk.bf16.vlgmr.msra.gmra.mxu0 %vm465_vm3, %v633_v23 }
 0x3e9   : > { %711 = vrot.lane.b32.xlu2 %v1194_v19, %s1061_s28  ;;  %s918_s28 = sshll.u32 %s1133_s13, 3 }
 0x3ea   : > { %s778_s21 = scalar_lea.hbm %s1307_s9, %s918_s28 }
 0x3eb   : > { %s782_s24 = sshll.u32 %s778_s21, 4  ;;  %s783_s24 = int_to_ptr.hbm [resolvable:$true] %s782_s24 }
 0x3ec   : > { %s1005_s27 = sshra.s32 %s783_s24, 4  ;;  %s1006_s27 = int_to_ptr.hbm [resolvable:$true] %s1005_s27 }
 0x3ed   : > { %s1007_s14 = scalar_lea.hbm %s1006_s27, 8  ;;  %p1012_p0 = scmp.lt.s32.totalorder %s1006_s27, %s1307_s9 }
 0x3ee   : > { %p1008_p11 = scmp.ne.s32.totalorder %s1006_s27, %s1007_s14  ;;  %p1013_p1 = scmp.lt.s32.totalorder %s1011_s1, %s1007_s14 }
 0x3f0   : > { %p1009_p12 = pnand %p1008_p11, %p1150_p5  ;;  %p1014_p2 = por %p1013_p1, %p1012_p0 }
 0x3f2   : > { %p1010_p13 = pneg %p1009_p12 }
 0x3f4   : > { %p1015_p3 = pnand %p1014_p2, %p1010_p13 }
 0x444   : > { %v706_v29 = vpop.xlane.xlu2 %705 }
 0x445   : > { %989 = vrcp.f32 %v706_v29 }
 0x44b   : > { %v990_v19 = vpop.eup %989 }
 0x44c   : > { %v708_v31 = vmul.f32 %v990_v19, %v984_v12  ;;  %v712_v32 = vpop.permute.xlu2 %711 }
 0x44d   : > { %724 = vmatpush.bf16.msrb.mxu3 %v712_v32 }
 0x44e   : > { %v710_v33 = vpack.c.bf16 %v708_v31, %v708_v31  ;;  %v709_v34 = vadd.f32 %v708_v31, %v632_v21 }
 0x450   : > { %915 = vmatmul.msk.bf16.vlgmr.msrb.gmra.mxu3 %vm465_vm3, %v710_v33  ;;  %v758_v35 = vmul.f32 0.25, %v709_v34 }
 0x452   : > { %759 = vst.msk [vmem:[%s345_s25] sm:$0xff] %vm465_vm3, %v758_v35 }
 0x455   : > { %v553_v36 = vpop.f32.mrf.mxu0 }
 0x456   : > { %v558_v37 = vpack.c.bf16 %v553_v36, %v553_v36 }
 0x458   : > { %909 = vmatmul.msk.bf16.vlgmr.msrb.gmra.mxu1 %vm445_vm1, %v558_v37 }
 0x45d   : > { %v555_v38 = vpop.f32.mrf.mxu0 }
 0x465   : > { %v649_v39 = vpop.f32.mrf.mxu0 }
 0x466   : > { %v654_v40 = vpack.c.bf16 %v649_v39, %v649_v39 }
 0x468   : > { %913 = vmatmul.msk.bf16.vlgmr.msra.gmra.mxu1 %vm445_vm1, %v654_v40 }
 0x46d   : > { %v651_v41 = vpop.f32.mrf.mxu0 }
 0x4d3   : > { %v726_v45 = vpop.f32.mrf.mxu3 }
 0x4d4   : > { %v731_v46 = vpack.c.bf16 %v726_v45, %v726_v45 }
 0x4d5   : > { %v575_v47 = vpop.f32.mrf.mxu1 }
 0x4d6   : > { %916 = vmatmul.msk.bf16.vlgmr.msrb.gmra.mxu0 %vm445_vm1, %v731_v46 }
 0x4db   : > { %v728_v48 = vpop.f32.mrf.mxu3 }
 0x4dc   : > { %1018 = shalt.err (!%p1015_p3)
}
 0x4dd   : > { %926 = dma.vmem_to_hbm [thread:$0]  (%p1150_p5), %s781_s22, 128, %s783_s24, %s765_s26   ;;  %v577_v49 = vpop.f32.mrf.mxu1  ;;  %v595_v50 = vadd.f32 %v1224_v55, %v575_v47  ;;  %v974_v54 = vld [vmem:[%s1305_s7] ss:$0 sm:$0xff] }
 0x4de   : > { %s1315_s1 = sshll.u32 %s1174_s29, 3 }
 0x4df   : > { %s358_s16 = scalar_lea.vmem %s1306_s8, %s1315_s1 }
 0x4e5   : > { %v670_v51 = vpop.f32.mrf.mxu1 }
 0x4e6   : > { %v674_v52 = vadd.f32 %v670_v51, %v595_v50 }
 0x4ed   : > { %v672_v53 = vpop.f32.mrf.mxu1 }
 0x553   : > { %v747_v56 = vpop.f32.mrf.mxu0 }
 0x554   : > { %v751_v57 = vadd.f32 %v747_v56, %v674_v52 }
 0x556   : > { %v756_v58 = vadd.f32 %v974_v54, %v751_v57 }
 0x558   : > { %757 = vst.msk [vmem:[%s358_s16] sm:$0xff] %vm385_vm0, %v756_v58 }
 0x55b   : > { %v749_v59 = vpop.f32.mrf.mxu0 }
 0x55c PF: > { %p932_p4 = scmp.ge.s32.totalorder %s1053_s12, 2  ;;  %s801_s19 = sand.u32 1, %s1041_s30  }
 0x55d   : > { %s802_s21 = scalar_lea.sflag [#allocation3], %s801_s19 }
 0x55e   : > { %p929_p5 = pnand %p932_p4, %p1154_p6 }
 0x560   : > { %p930_p7 = pneg %p929_p5 }
 0x562   : > { %1036 = dma.done.wait (%p930_p7), %s802_s21, 128  }
 0x563   : > { %1038 = vsyncadd (%p930_p7), %s802_s21, 4294967168  ;;  %p20_p8 = scmp.ge.s32.totalorder %s1137_s15, 4   ;;  %s1316_s30 = smov %s1045_s10 }
 0x564   : > { %s1317_s10 = smov %s1049_s11  ;;  %s1318_s11 = smov %s1148_s18 }
 0x565   : > { %s1319_s12 = smov %s1137_s15  ;;  %22 = sbr.rel (!%p20_p8) target bundleno = 6 (0x6), region = 102 }
 0x56a   :  { %808 = vsyncpa [#allocation3], 1 }
 0x56b   :  { %810 = vsyncpa [#allocation3 + $0x1], 1 }

</bundles_post_ra>
